<compile_context>
chip_gen: v5e
topology: v5e:2x2
jax: 0.10.0
libtpu: 0.0.40
codegen_flags: <defaults>
</compile_context>

<pallas_src>
import functools

import jax
import jax.numpy as jnp
from jax.experimental import pallas as pl


# ---------------------------------------------------------------------------
# Fused whole-forward Pallas kernel (built as a closure over static dims)
# ---------------------------------------------------------------------------
def _make_fused_kernel(dims):
    h_a = dims["d_ah"]                 # acoustic hidden width (lanes [0 : h_a])
    d_aout = dims["d_aout"]
    d_vout = dims["d_vout"]
    d_tout = dims["d_tout"]
    nc = dims["n_class"]

    def kernel(text_ref, xv_ref, xa_ref, lens_ref,
               wih_a_ref, wih_v_ref, whh_ref, b_ref, wout_ref, bout_ref,
               w1_ref, b1_ref, w2_ref, b2_ref, w3_ref, b3_ref,
               out_t_ref, out_v_ref, out_a_ref, out_tri_ref):
        f32 = jnp.float32
        B, T, d_ain = xa_ref.shape
        _, _, d_vin = xv_ref.shape
        Hm = whh_ref.shape[0]          # merged hidden = d_ah + d_vh

        # ----- merged block-diagonal LSTM encoders -------------------------
        # Lane layout of the merged hidden: [acoustic (0:h_a) | visual (h_a:Hm)],
        # each of the 4 gate blocks (i, f, g, o) is Hm lanes wide.
        xa = xa_ref[...]                                   # (B, T, d_ain)
        xv = xv_ref[...]                                   # (B, T, d_vin)
        # Hoisted input projection: one (B*T, D) matmul per modality.
        gx = (jnp.dot(xa.reshape(B * T, d_ain), wih_a_ref[...],
                      preferred_element_type=f32)
              + jnp.dot(xv.reshape(B * T, d_vin), wih_v_ref[...],
                        preferred_element_type=f32)
              + b_ref[...]).reshape(B, T, 4 * Hm)

        whh = whh_ref[...]                                 # (Hm, 4*Hm)
        lens = lens_ref[...]                               # (B, 2) int32: [a_len, v_len]
        lane = jax.lax.broadcasted_iota(jnp.int32, (B, Hm), 1)
        len_lane = jnp.where(lane < h_a, lens[:, 0:1], lens[:, 1:2])   # (B, Hm)

        h = jnp.zeros((B, Hm), f32)
        c = jnp.zeros((B, Hm), f32)
        # Fully unrolled recurrence (T is small and static).  Past each
        # sequence's length the state is frozen, reproducing the final hidden
        # state of pack_padded_sequence + LSTM.
        for t in range(T):
            g = gx[:, t, :] + jnp.dot(h, whh, preferred_element_type=f32)
            i_g = jax.nn.sigmoid(g[:, 0 * Hm:1 * Hm])
            f_g = jax.nn.sigmoid(g[:, 1 * Hm:2 * Hm])
            g_g = jnp.tanh(g[:, 2 * Hm:3 * Hm])
            o_g = jax.nn.sigmoid(g[:, 3 * Hm:4 * Hm])
            c_new = f_g * c + i_g * g_g
            h_new = o_g * jnp.tanh(c_new)
            valid = t < len_lane
            h = jnp.where(valid, h_new, h)
            c = jnp.where(valid, c_new, c)

        # Block-diagonal output Linear -> [acoustic_f | visual_f] lanes.
        enc = jnp.dot(h, wout_ref[...], preferred_element_type=f32) + bout_ref[...]
        acoustic_f = enc[:, 0:d_aout]                      # (B, d_aout)
        visual_f = enc[:, d_aout:d_aout + d_vout]          # (B, d_vout)
        text = text_ref[...]                               # (B, d_tout)

        # ----- four SubNet heads via block-diagonal W1 / W2 / W3 ------------
        # W1 row space is ordered [text | acoustic_f | visual_f] (the fusion
        # head's torch.cat order), so the concatenated fusion input is realised
        # by the three dots below -- no in-kernel concatenation needed.
        w1 = w1_ref[...]
        h1 = jnp.maximum(
            jnp.dot(text, w1[0:d_tout, :], preferred_element_type=f32)
            + jnp.dot(acoustic_f, w1[d_tout:d_tout + d_aout, :],
                      preferred_element_type=f32)
            + jnp.dot(visual_f, w1[d_tout + d_aout:, :],
                      preferred_element_type=f32)
            + b1_ref[...], 0.0)                            # (B, 4*d_prjh)
        h2 = jnp.maximum(
            jnp.dot(h1, w2_ref[...], preferred_element_type=f32) + b2_ref[...],
            0.0)
        preds = jnp.dot(h2, w3_ref[...], preferred_element_type=f32) + b3_ref[...]
        # Head column order: [text, visual, acoustic, fusion].
        out_t_ref[...] = preds[:, 0 * nc:1 * nc]
        out_v_ref[...] = preds[:, 1 * nc:2 * nc]
        out_a_ref[...] = preds[:, 2 * nc:3 * nc]
        out_tri_ref[...] = preds[:, 3 * nc:4 * nc]

    return kernel


# ---------------------------------------------------------------------------
# Parameter packing (block-diagonal modality / head merges, natural widths)
# ---------------------------------------------------------------------------
def _place_gate_cols(w, h, offset, hm):
    """Scatter the 4 gate blocks (each `h` wide) of w's last dim into a merged
    4*hm-wide gate layout, each at lane `offset` inside its merged gate block."""
    rows = w.shape[0]
    out = jnp.zeros((rows, 4 * hm), w.dtype)
    for k in range(4):
        out = out.at[:, k * hm + offset: k * hm + offset + h].set(
            w[:, k * h:(k + 1) * h])
    return out


def pack_params(acoustic_enc, visual_enc, text_clf, visual_clf, acoustic_clf,
                fusion_prj, dims):
    h_a, h_v = dims["d_ah"], dims["d_vh"]
    hm = h_a + h_v
    d_aout, d_vout, d_tout = dims["d_aout"], dims["d_vout"], dims["d_tout"]
    ph, nc = dims["d_prjh"], dims["n_class"]

    # --- merged LSTM: acoustic lanes [0:h_a], visual lanes [h_a:hm] ---------
    wih_a = _place_gate_cols(acoustic_enc["w_ih"], h_a, 0, hm)      # (d_ain, 4*hm)
    wih_v = _place_gate_cols(visual_enc["w_ih"], h_v, h_a, hm)      # (d_vin, 4*hm)
    whh = jnp.zeros((hm, 4 * hm), jnp.float32)
    whh = whh.at[0:h_a, :].set(_place_gate_cols(acoustic_enc["w_hh"], h_a, 0, hm))
    whh = whh.at[h_a:hm, :].set(_place_gate_cols(visual_enc["w_hh"], h_v, h_a, hm))
    b = (_place_gate_cols(acoustic_enc["b"], h_a, 0, hm)
         + _place_gate_cols(visual_enc["b"], h_v, h_a, hm))          # (1, 4*hm)
    wout = jnp.zeros((hm, d_aout + d_vout), jnp.float32)
    wout = wout.at[0:h_a, 0:d_aout].set(acoustic_enc["w_out"])
    wout = wout.at[h_a:hm, d_aout:].set(visual_enc["w_out"])
    bout = jnp.concatenate([acoustic_enc["b_out"], visual_enc["b_out"]], axis=1)

    # --- merged SubNet heads: column order [text, visual, acoustic, fusion] -
    # W1 row space = [text(0:d_tout) | acoustic_f | visual_f] (fusion cat order).
    dz = d_tout + d_aout + d_vout
    heads = [text_clf, visual_clf, acoustic_clf, fusion_prj]
    w1 = jnp.zeros((dz, 4 * ph), jnp.float32)
    w1 = w1.at[0:d_tout, 0:ph].set(text_clf["w1"])
    w1 = w1.at[d_tout + d_aout:dz, ph:2 * ph].set(visual_clf["w1"])
    w1 = w1.at[d_tout:d_tout + d_aout, 2 * ph:3 * ph].set(acoustic_clf["w1"])
    w1 = w1.at[:, 3 * ph:4 * ph].set(fusion_prj["w1"])
    b1 = jnp.concatenate([hd["b1"] for hd in heads], axis=1)
    w2 = jnp.zeros((4 * ph, 4 * ph), jnp.float32)
    w3 = jnp.zeros((4 * ph, 4 * nc), jnp.float32)
    for k, hd in enumerate(heads):
        w2 = w2.at[k * ph:(k + 1) * ph, k * ph:(k + 1) * ph].set(hd["w2"])
        w3 = w3.at[k * ph:(k + 1) * ph, k * nc:(k + 1) * nc].set(hd["w3"])
    b2 = jnp.concatenate([hd["b2"] for hd in heads], axis=1)
    b3 = jnp.concatenate([hd["b3"] for hd in heads], axis=1)

    return dict(wih_a=wih_a, wih_v=wih_v, whh=whh, b=b, wout=wout, bout=bout,
                w1=w1, b1=b1, w2=w2, b2=b2, w3=w3, b3=b3)


# ---------------------------------------------------------------------------
# MSA_GB forward (matches the PyTorch module's return: 4 prediction tensors)
# ---------------------------------------------------------------------------
def msa_gb_forward(params, dims, sentences, visual, acoustic, v_len, a_len,
                   bert_sent, bert_sent_type, bert_sent_mask):
    del sentences, bert_sent_mask
    # TODO(synk): full BERT text encoder not implemented; deterministic
    # word + token-type embedding lookup of the [CLS] position is the proxy.
    text = (params["word_emb"][bert_sent[:, 0]]
            + params["type_emb"][bert_sent_type[:, 0]]).astype(jnp.float32)

    B = visual.shape[0]
    nc = dims["n_class"]
    lens = jnp.stack([a_len.astype(jnp.int32), v_len.astype(jnp.int32)],
                     axis=1)                                          # (B, 2)
    pk = params["packed"]
    kernel = _make_fused_kernel(dims)
    out_shape = tuple(jax.ShapeDtypeStruct((B, nc), jnp.float32) for _ in range(4))

    # Single fused launch: no grid, every (tiny) operand is a whole-array VMEM
    # block; total VMEM footprint is well under 1 MiB on every TPU generation.
    preds_t, preds_v, preds_a, preds_tri = pl.pallas_call(
        kernel,
        out_shape=out_shape,
    )(text, visual.astype(jnp.float32), acoustic.astype(jnp.float32), lens,
      pk["wih_a"], pk["wih_v"], pk["whh"], pk["b"], pk["wout"], pk["bout"],
      pk["w1"], pk["b1"], pk["w2"], pk["b2"], pk["w3"], pk["b3"])
    return preds_t, preds_v, preds_a, preds_tri


# ---------------------------------------------------------------------------
# Parameter construction (deterministic, synthetic, unpacked)
# ---------------------------------------------------------------------------
def _dense(key, din, dout, scale=0.1):
    return scale * jax.random.normal(key, (din, dout), jnp.float32)


def make_lstm_params(key, d_in, hidden, d_out):
    k = jax.random.split(key, 5)
    return dict(
        w_ih=_dense(k[0], d_in, 4 * hidden),
        w_hh=_dense(k[1], hidden, 4 * hidden),
        b=_dense(k[2], 1, 4 * hidden),
        w_out=_dense(k[3], hidden, d_out),
        b_out=_dense(k[4], 1, d_out),
    )


def make_subnet_params(key, in_size, hidden, n_class):
    k = jax.random.split(key, 6)
    return dict(
        w1=_dense(k[0], in_size, hidden), b1=_dense(k[1], 1, hidden),
        w2=_dense(k[2], hidden, hidden), b2=_dense(k[3], 1, hidden),
        w3=_dense(k[4], hidden, n_class), b3=_dense(k[5], 1, n_class),
    )


# ---------------------------------------------------------------------------
# Pure-JAX references (for correctness checks)
# ---------------------------------------------------------------------------
def ref_rnn_encoder(x, lengths, p):
    B, T, _ = x.shape
    H = p["w_hh"].shape[0]
    h = jnp.zeros((B, H), jnp.float32)
    c = jnp.zeros((B, H), jnp.float32)
    for t in range(T):
        g = x[:, t, :] @ p["w_ih"] + h @ p["w_hh"] + p["b"]
        i_g = jax.nn.sigmoid(g[:, 0 * H:1 * H])
        f_g = jax.nn.sigmoid(g[:, 1 * H:2 * H])
        g_g = jnp.tanh(g[:, 2 * H:3 * H])
        o_g = jax.nn.sigmoid(g[:, 3 * H:4 * H])
        c_new = f_g * c + i_g * g_g
        h_new = o_g * jnp.tanh(c_new)
        valid = (t < lengths)[:, None]
        h = jnp.where(valid, h_new, h)
        c = jnp.where(valid, c_new, c)
    return h @ p["w_out"] + p["b_out"]


def ref_subnet(x, p):
    h1 = jnp.maximum(x @ p["w1"] + p["b1"], 0.0)
    h2 = jnp.maximum(h1 @ p["w2"] + p["b2"], 0.0)
    return h2 @ p["w3"] + p["b3"]


# ---------------------------------------------------------------------------
if __name__ == "__main__":
    # Hyper-parameters (small, consistent with the module's __init__)
    B = 2
    T_seq = 8                     # visual / acoustic sequence length
    bert_len = T_seq + 2
    d_tin = d_tout = 32
    d_vin, d_vh, d_vout = 16, 16, 16
    d_ain, d_ah, d_aout = 12, 16, 16
    d_prjh, n_class = 32, 1
    vocab, type_vocab = 50, 2
    dim_sum = d_tout + d_aout + d_vout

    dims = dict(d_ah=d_ah, d_vh=d_vh, d_aout=d_aout, d_vout=d_vout,
                d_tout=d_tout, d_prjh=d_prjh, n_class=n_class)

    root = jax.random.PRNGKey(0)
    keys = jax.random.split(root, 12)

    params = dict(
        word_emb=0.1 * jax.random.normal(keys[0], (vocab, d_tin), jnp.float32),
        type_emb=0.1 * jax.random.normal(keys[1], (type_vocab, d_tin), jnp.float32),
        visual_enc=make_lstm_params(keys[2], d_vin, d_vh, d_vout),
        acoustic_enc=make_lstm_params(keys[3], d_ain, d_ah, d_aout),
        fusion_prj=make_subnet_params(keys[4], dim_sum, d_prjh, n_class),
        text_clf=make_subnet_params(keys[5], d_tout, d_prjh, n_class),
        visual_clf=make_subnet_params(keys[6], d_vout, d_prjh, n_class),
        acoustic_clf=make_subnet_params(keys[7], d_aout, d_prjh, n_class),
    )
    # Pack (block-diagonally merge) parameters ONCE for the fused kernel.
    params["packed"] = pack_params(
        params["acoustic_enc"], params["visual_enc"], params["text_clf"],
        params["visual_clf"], params["acoustic_clf"], params["fusion_prj"], dims)

    # Example inputs
    sentences = jax.random.randint(keys[8], (T_seq, B), 0, vocab)  # unused (BERT path)
    visual = jax.random.normal(keys[9], (B, T_seq, d_vin), jnp.float32)
    acoustic = jax.random.normal(keys[10], (B, T_seq, d_ain), jnp.float32)
    v_len = jnp.array([T_seq, 5], jnp.int32)
    a_len = jnp.array([T_seq, 6], jnp.int32)
    bert_sent = jax.random.randint(keys[11], (B, bert_len), 0, vocab)
    bert_sent_type = jnp.zeros((B, bert_len), jnp.int32)
    bert_sent_mask = jnp.ones((B, bert_len), jnp.float32)

    # One jitted forward = (tiny embedding proxy) + ONE fused Pallas kernel.
    fwd = jax.jit(functools.partial(msa_gb_forward, params, dims))
    preds_t, preds_v, preds_a, preds_tri = fwd(
        sentences, visual, acoustic, v_len, a_len,
        bert_sent, bert_sent_type, bert_sent_mask)
    jax.block_until_ready((preds_t, preds_v, preds_a, preds_tri))

    # ----------------- correctness checks vs pure-JAX references -----------------
    ref_text = (params["word_emb"][bert_sent[:, 0]]
                + params["type_emb"][bert_sent_type[:, 0]])
    ref_vi = ref_rnn_encoder(visual, v_len, params["visual_enc"])
    ref_ac = ref_rnn_encoder(acoustic, a_len, params["acoustic_enc"])
    ref_pt = ref_subnet(ref_text, params["text_clf"])
    ref_pv = ref_subnet(ref_vi, params["visual_clf"])
    ref_pa = ref_subnet(ref_ac, params["acoustic_clf"])
    ref_ptri = ref_subnet(jnp.concatenate([ref_text, ref_ac, ref_vi], axis=1),
                          params["fusion_prj"])

    assert preds_t.shape == (B, n_class) and preds_tri.shape == (B, n_class)
    assert jnp.allclose(preds_t, ref_pt, atol=2e-3, rtol=2e-3)
    assert jnp.allclose(preds_v, ref_pv, atol=2e-3, rtol=2e-3)
    assert jnp.allclose(preds_a, ref_pa, atol=2e-3, rtol=2e-3)
    assert jnp.allclose(preds_tri, ref_ptri, atol=2e-3, rtol=2e-3)

    print("KERNEL_OK")
</pallas_src>

<mosaic_0001>
module attributes {stable_mosaic.version = 11 : i64} {
  func.func @kernel(%arg0: memref<2x32xf32, #tpu.memory_space<vmem>>, %arg1: memref<2x8x16xf32, #tpu.memory_space<vmem>>, %arg2: memref<2x8x12xf32, #tpu.memory_space<vmem>>, %arg3: memref<2x2xi32, #tpu.memory_space<vmem>>, %arg4: memref<12x128xf32, #tpu.memory_space<vmem>>, %arg5: memref<16x128xf32, #tpu.memory_space<vmem>>, %arg6: memref<32x128xf32, #tpu.memory_space<vmem>>, %arg7: memref<1x128xf32, #tpu.memory_space<vmem>>, %arg8: memref<32x32xf32, #tpu.memory_space<vmem>>, %arg9: memref<1x32xf32, #tpu.memory_space<vmem>>, %arg10: memref<64x128xf32, #tpu.memory_space<vmem>>, %arg11: memref<1x128xf32, #tpu.memory_space<vmem>>, %arg12: memref<128x128xf32, #tpu.memory_space<vmem>>, %arg13: memref<1x128xf32, #tpu.memory_space<vmem>>, %arg14: memref<128x4xf32, #tpu.memory_space<vmem>>, %arg15: memref<1x4xf32, #tpu.memory_space<vmem>>, %arg16: memref<2x1xf32, #tpu.memory_space<vmem>>, %arg17: memref<2x1xf32, #tpu.memory_space<vmem>>, %arg18: memref<2x1xf32, #tpu.memory_space<vmem>>, %arg19: memref<2x1xf32, #tpu.memory_space<vmem>>) attributes {dimension_semantics = [], scalar_prefetch = 0 : i64, scratch_operands = 0 : i64, tpu.core_type = #tpu.core_type<tc>} {
    %c0 = arith.constant 0 : index
    %c0_0 = arith.constant 0 : index
    %c0_1 = arith.constant 0 : index
    %0 = vector.load %arg2[%c0, %c0_0, %c0_1] : memref<2x8x12xf32, #tpu.memory_space<vmem>>, vector<2x8x12xf32>
    %c0_2 = arith.constant 0 : index
    %c0_3 = arith.constant 0 : index
    %c0_4 = arith.constant 0 : index
    %1 = vector.load %arg1[%c0_2, %c0_3, %c0_4] : memref<2x8x16xf32, #tpu.memory_space<vmem>>, vector<2x8x16xf32>
    %2 = vector.shape_cast %0 : vector<2x8x12xf32> to vector<16x12xf32>
    %c0_5 = arith.constant 0 : index
    %c0_6 = arith.constant 0 : index
    %3 = vector.load %arg4[%c0_5, %c0_6] : memref<12x128xf32, #tpu.memory_space<vmem>>, vector<12x128xf32>
    %cst = arith.constant dense<0.000000e+00> : vector<16x128xf32>
    %4 = tpu.matmul %2, %3, %cst {dimension_numbers = #tpu.dot_dimension_numbers<[1], [0], [0], [1], [0, 0, 1, 1], [], []>} : vector<16x12xf32>, vector<12x128xf32>, vector<16x128xf32> -> vector<16x128xf32>
    %5 = vector.shape_cast %1 : vector<2x8x16xf32> to vector<16x16xf32>
    %c0_7 = arith.constant 0 : index
    %c0_8 = arith.constant 0 : index
    %6 = vector.load %arg5[%c0_7, %c0_8] : memref<16x128xf32, #tpu.memory_space<vmem>>, vector<16x128xf32>
    %cst_9 = arith.constant dense<0.000000e+00> : vector<16x128xf32>
    %7 = tpu.matmul %5, %6, %cst_9 {dimension_numbers = #tpu.dot_dimension_numbers<[1], [0], [0], [1], [0, 0, 1, 1], [], []>} : vector<16x16xf32>, vector<16x128xf32>, vector<16x128xf32> -> vector<16x128xf32>
    %8 = arith.addf %4, %7 : vector<16x128xf32>
    %c0_10 = arith.constant 0 : index
    %c0_11 = arith.constant 0 : index
    %9 = vector.load %arg7[%c0_10, %c0_11] : memref<1x128xf32, #tpu.memory_space<vmem>>, vector<1x128xf32>
    %10 = vector.broadcast %9 : vector<1x128xf32> to vector<16x128xf32>
    %11 = arith.addf %8, %10 : vector<16x128xf32>
    %12 = vector.shape_cast %11 : vector<16x128xf32> to vector<2x8x128xf32>
    %c0_12 = arith.constant 0 : index
    %c0_13 = arith.constant 0 : index
    %13 = vector.load %arg6[%c0_12, %c0_13] : memref<32x128xf32, #tpu.memory_space<vmem>>, vector<32x128xf32>
    %c0_14 = arith.constant 0 : index
    %c0_15 = arith.constant 0 : index
    %14 = vector.load %arg3[%c0_14, %c0_15] : memref<2x2xi32, #tpu.memory_space<vmem>>, vector<2x2xi32>
    %15 = tpu.iota {dimensions = array<i32: 1>} : vector<2x32xi32>
    %c16_i32 = arith.constant 16 : i32
    %16 = vector.broadcast %c16_i32 : i32 to vector<2x32xi32>
    %17 = arith.cmpi slt, %15, %16 : vector<2x32xi32>
    %18 = vector.extract_strided_slice %14 {offsets = [0, 0], sizes = [2, 1], strides = [1, 1]} : vector<2x2xi32> to vector<2x1xi32>
    %19 = vector.extract_strided_slice %14 {offsets = [0, 1], sizes = [2, 1], strides = [1, 1]} : vector<2x2xi32> to vector<2x1xi32>
    %20 = vector.shape_cast %18 : vector<2x1xi32> to vector<2x1xi32>
    %21 = vector.broadcast %20 : vector<2x1xi32> to vector<2x32xi32>
    %22 = vector.shape_cast %19 : vector<2x1xi32> to vector<2x1xi32>
    %23 = vector.broadcast %22 : vector<2x1xi32> to vector<2x32xi32>
    %24 = arith.select %17, %21, %23 : vector<2x32xi1>, vector<2x32xi32>
    %cst_16 = arith.constant 0.000000e+00 : f32
    %25 = vector.broadcast %cst_16 : f32 to vector<2x32xf32>
    %cst_17 = arith.constant 0.000000e+00 : f32
    %26 = vector.broadcast %cst_17 : f32 to vector<2x32xf32>
    %27 = vector.extract_strided_slice %12 {offsets = [0, 0, 0], sizes = [2, 1, 128], strides = [1, 1, 1]} : vector<2x8x128xf32> to vector<2x1x128xf32>
    %28 = vector.shape_cast %27 : vector<2x1x128xf32> to vector<2x128xf32>
    %cst_18 = arith.constant dense<0.000000e+00> : vector<2x128xf32>
    %29 = tpu.matmul %25, %13, %cst_18 {dimension_numbers = #tpu.dot_dimension_numbers<[1], [0], [0], [1], [0, 0, 1, 1], [], []>} : vector<2x32xf32>, vector<32x128xf32>, vector<2x128xf32> -> vector<2x128xf32>
    %30 = arith.addf %28, %29 : vector<2x128xf32>
    %31 = vector.extract_strided_slice %30 {offsets = [0, 0], sizes = [2, 32], strides = [1, 1]} : vector<2x128xf32> to vector<2x32xf32>
    %32 = arith.negf %31 : vector<2x32xf32>
    %33 = math.exp %32 : vector<2x32xf32>
    %cst_19 = arith.constant 1.000000e+00 : f32
    %34 = vector.broadcast %cst_19 : f32 to vector<2x32xf32>
    %35 = arith.addf %34, %33 : vector<2x32xf32>
    %36 = arith.divf %34, %35 : vector<2x32xf32>
    %37 = vector.extract_strided_slice %30 {offsets = [0, 32], sizes = [2, 32], strides = [1, 1]} : vector<2x128xf32> to vector<2x32xf32>
    %38 = arith.negf %37 : vector<2x32xf32>
    %39 = math.exp %38 : vector<2x32xf32>
    %cst_20 = arith.constant 1.000000e+00 : f32
    %40 = vector.broadcast %cst_20 : f32 to vector<2x32xf32>
    %41 = arith.addf %40, %39 : vector<2x32xf32>
    %42 = arith.divf %40, %41 : vector<2x32xf32>
    %43 = vector.extract_strided_slice %30 {offsets = [0, 64], sizes = [2, 32], strides = [1, 1]} : vector<2x128xf32> to vector<2x32xf32>
    %44 = math.tanh %43 : vector<2x32xf32>
    %45 = vector.extract_strided_slice %30 {offsets = [0, 96], sizes = [2, 32], strides = [1, 1]} : vector<2x128xf32> to vector<2x32xf32>
    %46 = arith.negf %45 : vector<2x32xf32>
    %47 = math.exp %46 : vector<2x32xf32>
    %cst_21 = arith.constant 1.000000e+00 : f32
    %48 = vector.broadcast %cst_21 : f32 to vector<2x32xf32>
    %49 = arith.addf %48, %47 : vector<2x32xf32>
    %50 = arith.divf %48, %49 : vector<2x32xf32>
    %51 = arith.mulf %42, %26 : vector<2x32xf32>
    %52 = arith.mulf %36, %44 : vector<2x32xf32>
    %53 = arith.addf %51, %52 : vector<2x32xf32>
    %54 = math.tanh %53 : vector<2x32xf32>
    %55 = arith.mulf %50, %54 : vector<2x32xf32>
    %c0_i32 = arith.constant 0 : i32
    %56 = vector.broadcast %c0_i32 : i32 to vector<2x32xi32>
    %57 = arith.cmpi sgt, %24, %56 : vector<2x32xi32>
    %58 = arith.select %57, %55, %25 : vector<2x32xi1>, vector<2x32xf32>
    %59 = arith.select %57, %53, %26 : vector<2x32xi1>, vector<2x32xf32>
    %60 = vector.extract_strided_slice %12 {offsets = [0, 1, 0], sizes = [2, 1, 128], strides = [1, 1, 1]} : vector<2x8x128xf32> to vector<2x1x128xf32>
    %61 = vector.shape_cast %60 : vector<2x1x128xf32> to vector<2x128xf32>
    %cst_22 = arith.constant dense<0.000000e+00> : vector<2x128xf32>
    %62 = tpu.matmul %58, %13, %cst_22 {dimension_numbers = #tpu.dot_dimension_numbers<[1], [0], [0], [1], [0, 0, 1, 1], [], []>} : vector<2x32xf32>, vector<32x128xf32>, vector<2x128xf32> -> vector<2x128xf32>
    %63 = arith.addf %61, %62 : vector<2x128xf32>
    %64 = vector.extract_strided_slice %63 {offsets = [0, 0], sizes = [2, 32], strides = [1, 1]} : vector<2x128xf32> to vector<2x32xf32>
    %65 = arith.negf %64 : vector<2x32xf32>
    %66 = math.exp %65 : vector<2x32xf32>
    %cst_23 = arith.constant 1.000000e+00 : f32
    %67 = vector.broadcast %cst_23 : f32 to vector<2x32xf32>
    %68 = arith.addf %67, %66 : vector<2x32xf32>
    %69 = arith.divf %67, %68 : vector<2x32xf32>
    %70 = vector.extract_strided_slice %63 {offsets = [0, 32], sizes = [2, 32], strides = [1, 1]} : vector<2x128xf32> to vector<2x32xf32>
    %71 = arith.negf %70 : vector<2x32xf32>
    %72 = math.exp %71 : vector<2x32xf32>
    %cst_24 = arith.constant 1.000000e+00 : f32
    %73 = vector.broadcast %cst_24 : f32 to vector<2x32xf32>
    %74 = arith.addf %73, %72 : vector<2x32xf32>
    %75 = arith.divf %73, %74 : vector<2x32xf32>
    %76 = vector.extract_strided_slice %63 {offsets = [0, 64], sizes = [2, 32], strides = [1, 1]} : vector<2x128xf32> to vector<2x32xf32>
    %77 = math.tanh %76 : vector<2x32xf32>
    %78 = vector.extract_strided_slice %63 {offsets = [0, 96], sizes = [2, 32], strides = [1, 1]} : vector<2x128xf32> to vector<2x32xf32>
    %79 = arith.negf %78 : vector<2x32xf32>
    %80 = math.exp %79 : vector<2x32xf32>
    %cst_25 = arith.constant 1.000000e+00 : f32
    %81 = vector.broadcast %cst_25 : f32 to vector<2x32xf32>
    %82 = arith.addf %81, %80 : vector<2x32xf32>
    %83 = arith.divf %81, %82 : vector<2x32xf32>
    %84 = arith.mulf %75, %59 : vector<2x32xf32>
    %85 = arith.mulf %69, %77 : vector<2x32xf32>
    %86 = arith.addf %84, %85 : vector<2x32xf32>
    %87 = math.tanh %86 : vector<2x32xf32>
    %88 = arith.mulf %83, %87 : vector<2x32xf32>
    %c1_i32 = arith.constant 1 : i32
    %89 = vector.broadcast %c1_i32 : i32 to vector<2x32xi32>
    %90 = arith.cmpi sgt, %24, %89 : vector<2x32xi32>
    %91 = arith.select %90, %88, %58 : vector<2x32xi1>, vector<2x32xf32>
    %92 = arith.select %90, %86, %59 : vector<2x32xi1>, vector<2x32xf32>
    %93 = vector.extract_strided_slice %12 {offsets = [0, 2, 0], sizes = [2, 1, 128], strides = [1, 1, 1]} : vector<2x8x128xf32> to vector<2x1x128xf32>
    %94 = vector.shape_cast %93 : vector<2x1x128xf32> to vector<2x128xf32>
    %cst_26 = arith.constant dense<0.000000e+00> : vector<2x128xf32>
    %95 = tpu.matmul %91, %13, %cst_26 {dimension_numbers = #tpu.dot_dimension_numbers<[1], [0], [0], [1], [0, 0, 1, 1], [], []>} : vector<2x32xf32>, vector<32x128xf32>, vector<2x128xf32> -> vector<2x128xf32>
    %96 = arith.addf %94, %95 : vector<2x128xf32>
    %97 = vector.extract_strided_slice %96 {offsets = [0, 0], sizes = [2, 32], strides = [1, 1]} : vector<2x128xf32> to vector<2x32xf32>
    %98 = arith.negf %97 : vector<2x32xf32>
    %99 = math.exp %98 : vector<2x32xf32>
    %cst_27 = arith.constant 1.000000e+00 : f32
    %100 = vector.broadcast %cst_27 : f32 to vector<2x32xf32>
    %101 = arith.addf %100, %99 : vector<2x32xf32>
    %102 = arith.divf %100, %101 : vector<2x32xf32>
    %103 = vector.extract_strided_slice %96 {offsets = [0, 32], sizes = [2, 32], strides = [1, 1]} : vector<2x128xf32> to vector<2x32xf32>
    %104 = arith.negf %103 : vector<2x32xf32>
    %105 = math.exp %104 : vector<2x32xf32>
    %cst_28 = arith.constant 1.000000e+00 : f32
    %106 = vector.broadcast %cst_28 : f32 to vector<2x32xf32>
    %107 = arith.addf %106, %105 : vector<2x32xf32>
    %108 = arith.divf %106, %107 : vector<2x32xf32>
    %109 = vector.extract_strided_slice %96 {offsets = [0, 64], sizes = [2, 32], strides = [1, 1]} : vector<2x128xf32> to vector<2x32xf32>
    %110 = math.tanh %109 : vector<2x32xf32>
    %111 = vector.extract_strided_slice %96 {offsets = [0, 96], sizes = [2, 32], strides = [1, 1]} : vector<2x128xf32> to vector<2x32xf32>
    %112 = arith.negf %111 : vector<2x32xf32>
    %113 = math.exp %112 : vector<2x32xf32>
    %cst_29 = arith.constant 1.000000e+00 : f32
    %114 = vector.broadcast %cst_29 : f32 to vector<2x32xf32>
    %115 = arith.addf %114, %113 : vector<2x32xf32>
    %116 = arith.divf %114, %115 : vector<2x32xf32>
    %117 = arith.mulf %108, %92 : vector<2x32xf32>
    %118 = arith.mulf %102, %110 : vector<2x32xf32>
    %119 = arith.addf %117, %118 : vector<2x32xf32>
    %120 = math.tanh %119 : vector<2x32xf32>
    %121 = arith.mulf %116, %120 : vector<2x32xf32>
    %c2_i32 = arith.constant 2 : i32
    %122 = vector.broadcast %c2_i32 : i32 to vector<2x32xi32>
    %123 = arith.cmpi sgt, %24, %122 : vector<2x32xi32>
    %124 = arith.select %123, %121, %91 : vector<2x32xi1>, vector<2x32xf32>
    %125 = arith.select %123, %119, %92 : vector<2x32xi1>, vector<2x32xf32>
    %126 = vector.extract_strided_slice %12 {offsets = [0, 3, 0], sizes = [2, 1, 128], strides = [1, 1, 1]} : vector<2x8x128xf32> to vector<2x1x128xf32>
    %127 = vector.shape_cast %126 : vector<2x1x128xf32> to vector<2x128xf32>
    %cst_30 = arith.constant dense<0.000000e+00> : vector<2x128xf32>
    %128 = tpu.matmul %124, %13, %cst_30 {dimension_numbers = #tpu.dot_dimension_numbers<[1], [0], [0], [1], [0, 0, 1, 1], [], []>} : vector<2x32xf32>, vector<32x128xf32>, vector<2x128xf32> -> vector<2x128xf32>
    %129 = arith.addf %127, %128 : vector<2x128xf32>
    %130 = vector.extract_strided_slice %129 {offsets = [0, 0], sizes = [2, 32], strides = [1, 1]} : vector<2x128xf32> to vector<2x32xf32>
    %131 = arith.negf %130 : vector<2x32xf32>
    %132 = math.exp %131 : vector<2x32xf32>
    %cst_31 = arith.constant 1.000000e+00 : f32
    %133 = vector.broadcast %cst_31 : f32 to vector<2x32xf32>
    %134 = arith.addf %133, %132 : vector<2x32xf32>
    %135 = arith.divf %133, %134 : vector<2x32xf32>
    %136 = vector.extract_strided_slice %129 {offsets = [0, 32], sizes = [2, 32], strides = [1, 1]} : vector<2x128xf32> to vector<2x32xf32>
    %137 = arith.negf %136 : vector<2x32xf32>
    %138 = math.exp %137 : vector<2x32xf32>
    %cst_32 = arith.constant 1.000000e+00 : f32
    %139 = vector.broadcast %cst_32 : f32 to vector<2x32xf32>
    %140 = arith.addf %139, %138 : vector<2x32xf32>
    %141 = arith.divf %139, %140 : vector<2x32xf32>
    %142 = vector.extract_strided_slice %129 {offsets = [0, 64], sizes = [2, 32], strides = [1, 1]} : vector<2x128xf32> to vector<2x32xf32>
    %143 = math.tanh %142 : vector<2x32xf32>
    %144 = vector.extract_strided_slice %129 {offsets = [0, 96], sizes = [2, 32], strides = [1, 1]} : vector<2x128xf32> to vector<2x32xf32>
    %145 = arith.negf %144 : vector<2x32xf32>
    %146 = math.exp %145 : vector<2x32xf32>
    %cst_33 = arith.constant 1.000000e+00 : f32
    %147 = vector.broadcast %cst_33 : f32 to vector<2x32xf32>
    %148 = arith.addf %147, %146 : vector<2x32xf32>
    %149 = arith.divf %147, %148 : vector<2x32xf32>
    %150 = arith.mulf %141, %125 : vector<2x32xf32>
    %151 = arith.mulf %135, %143 : vector<2x32xf32>
    %152 = arith.addf %150, %151 : vector<2x32xf32>
    %153 = math.tanh %152 : vector<2x32xf32>
    %154 = arith.mulf %149, %153 : vector<2x32xf32>
    %c3_i32 = arith.constant 3 : i32
    %155 = vector.broadcast %c3_i32 : i32 to vector<2x32xi32>
    %156 = arith.cmpi sgt, %24, %155 : vector<2x32xi32>
    %157 = arith.select %156, %154, %124 : vector<2x32xi1>, vector<2x32xf32>
    %158 = arith.select %156, %152, %125 : vector<2x32xi1>, vector<2x32xf32>
    %159 = vector.extract_strided_slice %12 {offsets = [0, 4, 0], sizes = [2, 1, 128], strides = [1, 1, 1]} : vector<2x8x128xf32> to vector<2x1x128xf32>
    %160 = vector.shape_cast %159 : vector<2x1x128xf32> to vector<2x128xf32>
    %cst_34 = arith.constant dense<0.000000e+00> : vector<2x128xf32>
    %161 = tpu.matmul %157, %13, %cst_34 {dimension_numbers = #tpu.dot_dimension_numbers<[1], [0], [0], [1], [0, 0, 1, 1], [], []>} : vector<2x32xf32>, vector<32x128xf32>, vector<2x128xf32> -> vector<2x128xf32>
    %162 = arith.addf %160, %161 : vector<2x128xf32>
    %163 = vector.extract_strided_slice %162 {offsets = [0, 0], sizes = [2, 32], strides = [1, 1]} : vector<2x128xf32> to vector<2x32xf32>
    %164 = arith.negf %163 : vector<2x32xf32>
    %165 = math.exp %164 : vector<2x32xf32>
    %cst_35 = arith.constant 1.000000e+00 : f32
    %166 = vector.broadcast %cst_35 : f32 to vector<2x32xf32>
    %167 = arith.addf %166, %165 : vector<2x32xf32>
    %168 = arith.divf %166, %167 : vector<2x32xf32>
    %169 = vector.extract_strided_slice %162 {offsets = [0, 32], sizes = [2, 32], strides = [1, 1]} : vector<2x128xf32> to vector<2x32xf32>
    %170 = arith.negf %169 : vector<2x32xf32>
    %171 = math.exp %170 : vector<2x32xf32>
    %cst_36 = arith.constant 1.000000e+00 : f32
    %172 = vector.broadcast %cst_36 : f32 to vector<2x32xf32>
    %173 = arith.addf %172, %171 : vector<2x32xf32>
    %174 = arith.divf %172, %173 : vector<2x32xf32>
    %175 = vector.extract_strided_slice %162 {offsets = [0, 64], sizes = [2, 32], strides = [1, 1]} : vector<2x128xf32> to vector<2x32xf32>
    %176 = math.tanh %175 : vector<2x32xf32>
    %177 = vector.extract_strided_slice %162 {offsets = [0, 96], sizes = [2, 32], strides = [1, 1]} : vector<2x128xf32> to vector<2x32xf32>
    %178 = arith.negf %177 : vector<2x32xf32>
    %179 = math.exp %178 : vector<2x32xf32>
    %cst_37 = arith.constant 1.000000e+00 : f32
    %180 = vector.broadcast %cst_37 : f32 to vector<2x32xf32>
    %181 = arith.addf %180, %179 : vector<2x32xf32>
    %182 = arith.divf %180, %181 : vector<2x32xf32>
    %183 = arith.mulf %174, %158 : vector<2x32xf32>
    %184 = arith.mulf %168, %176 : vector<2x32xf32>
    %185 = arith.addf %183, %184 : vector<2x32xf32>
    %186 = math.tanh %185 : vector<2x32xf32>
    %187 = arith.mulf %182, %186 : vector<2x32xf32>
    %c4_i32 = arith.constant 4 : i32
    %188 = vector.broadcast %c4_i32 : i32 to vector<2x32xi32>
    %189 = arith.cmpi sgt, %24, %188 : vector<2x32xi32>
    %190 = arith.select %189, %187, %157 : vector<2x32xi1>, vector<2x32xf32>
    %191 = arith.select %189, %185, %158 : vector<2x32xi1>, vector<2x32xf32>
    %192 = vector.extract_strided_slice %12 {offsets = [0, 5, 0], sizes = [2, 1, 128], strides = [1, 1, 1]} : vector<2x8x128xf32> to vector<2x1x128xf32>
    %193 = vector.shape_cast %192 : vector<2x1x128xf32> to vector<2x128xf32>
    %cst_38 = arith.constant dense<0.000000e+00> : vector<2x128xf32>
    %194 = tpu.matmul %190, %13, %cst_38 {dimension_numbers = #tpu.dot_dimension_numbers<[1], [0], [0], [1], [0, 0, 1, 1], [], []>} : vector<2x32xf32>, vector<32x128xf32>, vector<2x128xf32> -> vector<2x128xf32>
    %195 = arith.addf %193, %194 : vector<2x128xf32>
    %196 = vector.extract_strided_slice %195 {offsets = [0, 0], sizes = [2, 32], strides = [1, 1]} : vector<2x128xf32> to vector<2x32xf32>
    %197 = arith.negf %196 : vector<2x32xf32>
    %198 = math.exp %197 : vector<2x32xf32>
    %cst_39 = arith.constant 1.000000e+00 : f32
    %199 = vector.broadcast %cst_39 : f32 to vector<2x32xf32>
    %200 = arith.addf %199, %198 : vector<2x32xf32>
    %201 = arith.divf %199, %200 : vector<2x32xf32>
    %202 = vector.extract_strided_slice %195 {offsets = [0, 32], sizes = [2, 32], strides = [1, 1]} : vector<2x128xf32> to vector<2x32xf32>
    %203 = arith.negf %202 : vector<2x32xf32>
    %204 = math.exp %203 : vector<2x32xf32>
    %cst_40 = arith.constant 1.000000e+00 : f32
    %205 = vector.broadcast %cst_40 : f32 to vector<2x32xf32>
    %206 = arith.addf %205, %204 : vector<2x32xf32>
    %207 = arith.divf %205, %206 : vector<2x32xf32>
    %208 = vector.extract_strided_slice %195 {offsets = [0, 64], sizes = [2, 32], strides = [1, 1]} : vector<2x128xf32> to vector<2x32xf32>
    %209 = math.tanh %208 : vector<2x32xf32>
    %210 = vector.extract_strided_slice %195 {offsets = [0, 96], sizes = [2, 32], strides = [1, 1]} : vector<2x128xf32> to vector<2x32xf32>
    %211 = arith.negf %210 : vector<2x32xf32>
    %212 = math.exp %211 : vector<2x32xf32>
    %cst_41 = arith.constant 1.000000e+00 : f32
    %213 = vector.broadcast %cst_41 : f32 to vector<2x32xf32>
    %214 = arith.addf %213, %212 : vector<2x32xf32>
    %215 = arith.divf %213, %214 : vector<2x32xf32>
    %216 = arith.mulf %207, %191 : vector<2x32xf32>
    %217 = arith.mulf %201, %209 : vector<2x32xf32>
    %218 = arith.addf %216, %217 : vector<2x32xf32>
    %219 = math.tanh %218 : vector<2x32xf32>
    %220 = arith.mulf %215, %219 : vector<2x32xf32>
    %c5_i32 = arith.constant 5 : i32
    %221 = vector.broadcast %c5_i32 : i32 to vector<2x32xi32>
    %222 = arith.cmpi sgt, %24, %221 : vector<2x32xi32>
    %223 = arith.select %222, %220, %190 : vector<2x32xi1>, vector<2x32xf32>
    %224 = arith.select %222, %218, %191 : vector<2x32xi1>, vector<2x32xf32>
    %225 = vector.extract_strided_slice %12 {offsets = [0, 6, 0], sizes = [2, 1, 128], strides = [1, 1, 1]} : vector<2x8x128xf32> to vector<2x1x128xf32>
    %226 = vector.shape_cast %225 : vector<2x1x128xf32> to vector<2x128xf32>
    %cst_42 = arith.constant dense<0.000000e+00> : vector<2x128xf32>
    %227 = tpu.matmul %223, %13, %cst_42 {dimension_numbers = #tpu.dot_dimension_numbers<[1], [0], [0], [1], [0, 0, 1, 1], [], []>} : vector<2x32xf32>, vector<32x128xf32>, vector<2x128xf32> -> vector<2x128xf32>
    %228 = arith.addf %226, %227 : vector<2x128xf32>
    %229 = vector.extract_strided_slice %228 {offsets = [0, 0], sizes = [2, 32], strides = [1, 1]} : vector<2x128xf32> to vector<2x32xf32>
    %230 = arith.negf %229 : vector<2x32xf32>
    %231 = math.exp %230 : vector<2x32xf32>
    %cst_43 = arith.constant 1.000000e+00 : f32
    %232 = vector.broadcast %cst_43 : f32 to vector<2x32xf32>
    %233 = arith.addf %232, %231 : vector<2x32xf32>
    %234 = arith.divf %232, %233 : vector<2x32xf32>
    %235 = vector.extract_strided_slice %228 {offsets = [0, 32], sizes = [2, 32], strides = [1, 1]} : vector<2x128xf32> to vector<2x32xf32>
    %236 = arith.negf %235 : vector<2x32xf32>
    %237 = math.exp %236 : vector<2x32xf32>
    %cst_44 = arith.constant 1.000000e+00 : f32
    %238 = vector.broadcast %cst_44 : f32 to vector<2x32xf32>
    %239 = arith.addf %238, %237 : vector<2x32xf32>
    %240 = arith.divf %238, %239 : vector<2x32xf32>
    %241 = vector.extract_strided_slice %228 {offsets = [0, 64], sizes = [2, 32], strides = [1, 1]} : vector<2x128xf32> to vector<2x32xf32>
    %242 = math.tanh %241 : vector<2x32xf32>
    %243 = vector.extract_strided_slice %228 {offsets = [0, 96], sizes = [2, 32], strides = [1, 1]} : vector<2x128xf32> to vector<2x32xf32>
    %244 = arith.negf %243 : vector<2x32xf32>
    %245 = math.exp %244 : vector<2x32xf32>
    %cst_45 = arith.constant 1.000000e+00 : f32
    %246 = vector.broadcast %cst_45 : f32 to vector<2x32xf32>
    %247 = arith.addf %246, %245 : vector<2x32xf32>
    %248 = arith.divf %246, %247 : vector<2x32xf32>
    %249 = arith.mulf %240, %224 : vector<2x32xf32>
    %250 = arith.mulf %234, %242 : vector<2x32xf32>
    %251 = arith.addf %249, %250 : vector<2x32xf32>
    %252 = math.tanh %251 : vector<2x32xf32>
    %253 = arith.mulf %248, %252 : vector<2x32xf32>
    %c6_i32 = arith.constant 6 : i32
    %254 = vector.broadcast %c6_i32 : i32 to vector<2x32xi32>
    %255 = arith.cmpi sgt, %24, %254 : vector<2x32xi32>
    %256 = arith.select %255, %253, %223 : vector<2x32xi1>, vector<2x32xf32>
    %257 = arith.select %255, %251, %224 : vector<2x32xi1>, vector<2x32xf32>
    %258 = vector.extract_strided_slice %12 {offsets = [0, 7, 0], sizes = [2, 1, 128], strides = [1, 1, 1]} : vector<2x8x128xf32> to vector<2x1x128xf32>
    %259 = vector.shape_cast %258 : vector<2x1x128xf32> to vector<2x128xf32>
    %cst_46 = arith.constant dense<0.000000e+00> : vector<2x128xf32>
    %260 = tpu.matmul %256, %13, %cst_46 {dimension_numbers = #tpu.dot_dimension_numbers<[1], [0], [0], [1], [0, 0, 1, 1], [], []>} : vector<2x32xf32>, vector<32x128xf32>, vector<2x128xf32> -> vector<2x128xf32>
    %261 = arith.addf %259, %260 : vector<2x128xf32>
    %262 = vector.extract_strided_slice %261 {offsets = [0, 0], sizes = [2, 32], strides = [1, 1]} : vector<2x128xf32> to vector<2x32xf32>
    %263 = arith.negf %262 : vector<2x32xf32>
    %264 = math.exp %263 : vector<2x32xf32>
    %cst_47 = arith.constant 1.000000e+00 : f32
    %265 = vector.broadcast %cst_47 : f32 to vector<2x32xf32>
    %266 = arith.addf %265, %264 : vector<2x32xf32>
    %267 = arith.divf %265, %266 : vector<2x32xf32>
    %268 = vector.extract_strided_slice %261 {offsets = [0, 32], sizes = [2, 32], strides = [1, 1]} : vector<2x128xf32> to vector<2x32xf32>
    %269 = arith.negf %268 : vector<2x32xf32>
    %270 = math.exp %269 : vector<2x32xf32>
    %cst_48 = arith.constant 1.000000e+00 : f32
    %271 = vector.broadcast %cst_48 : f32 to vector<2x32xf32>
    %272 = arith.addf %271, %270 : vector<2x32xf32>
    %273 = arith.divf %271, %272 : vector<2x32xf32>
    %274 = vector.extract_strided_slice %261 {offsets = [0, 64], sizes = [2, 32], strides = [1, 1]} : vector<2x128xf32> to vector<2x32xf32>
    %275 = math.tanh %274 : vector<2x32xf32>
    %276 = vector.extract_strided_slice %261 {offsets = [0, 96], sizes = [2, 32], strides = [1, 1]} : vector<2x128xf32> to vector<2x32xf32>
    %277 = arith.negf %276 : vector<2x32xf32>
    %278 = math.exp %277 : vector<2x32xf32>
    %cst_49 = arith.constant 1.000000e+00 : f32
    %279 = vector.broadcast %cst_49 : f32 to vector<2x32xf32>
    %280 = arith.addf %279, %278 : vector<2x32xf32>
    %281 = arith.divf %279, %280 : vector<2x32xf32>
    %282 = arith.mulf %273, %257 : vector<2x32xf32>
    %283 = arith.mulf %267, %275 : vector<2x32xf32>
    %284 = arith.addf %282, %283 : vector<2x32xf32>
    %285 = math.tanh %284 : vector<2x32xf32>
    %286 = arith.mulf %281, %285 : vector<2x32xf32>
    %c7_i32 = arith.constant 7 : i32
    %287 = vector.broadcast %c7_i32 : i32 to vector<2x32xi32>
    %288 = arith.cmpi sgt, %24, %287 : vector<2x32xi32>
    %289 = arith.select %288, %286, %256 : vector<2x32xi1>, vector<2x32xf32>
    %c0_50 = arith.constant 0 : index
    %c0_51 = arith.constant 0 : index
    %290 = vector.load %arg8[%c0_50, %c0_51] : memref<32x32xf32, #tpu.memory_space<vmem>>, vector<32x32xf32>
    %cst_52 = arith.constant dense<0.000000e+00> : vector<2x32xf32>
    %291 = tpu.matmul %289, %290, %cst_52 {dimension_numbers = #tpu.dot_dimension_numbers<[1], [0], [0], [1], [0, 0, 1, 1], [], []>} : vector<2x32xf32>, vector<32x32xf32>, vector<2x32xf32> -> vector<2x32xf32>
    %c0_53 = arith.constant 0 : index
    %c0_54 = arith.constant 0 : index
    %292 = vector.load %arg9[%c0_53, %c0_54] : memref<1x32xf32, #tpu.memory_space<vmem>>, vector<1x32xf32>
    %293 = vector.broadcast %292 : vector<1x32xf32> to vector<2x32xf32>
    %294 = arith.addf %291, %293 : vector<2x32xf32>
    %295 = vector.extract_strided_slice %294 {offsets = [0, 0], sizes = [2, 16], strides = [1, 1]} : vector<2x32xf32> to vector<2x16xf32>
    %296 = vector.extract_strided_slice %294 {offsets = [0, 16], sizes = [2, 16], strides = [1, 1]} : vector<2x32xf32> to vector<2x16xf32>
    %c0_55 = arith.constant 0 : index
    %c0_56 = arith.constant 0 : index
    %297 = vector.load %arg0[%c0_55, %c0_56] : memref<2x32xf32, #tpu.memory_space<vmem>>, vector<2x32xf32>
    %c0_57 = arith.constant 0 : index
    %c0_58 = arith.constant 0 : index
    %298 = vector.load %arg10[%c0_57, %c0_58] : memref<64x128xf32, #tpu.memory_space<vmem>>, vector<64x128xf32>
    %299 = vector.extract_strided_slice %298 {offsets = [0, 0], sizes = [32, 128], strides = [1, 1]} : vector<64x128xf32> to vector<32x128xf32>
    %cst_59 = arith.constant dense<0.000000e+00> : vector<2x128xf32>
    %300 = tpu.matmul %297, %299, %cst_59 {dimension_numbers = #tpu.dot_dimension_numbers<[1], [0], [0], [1], [0, 0, 1, 1], [], []>} : vector<2x32xf32>, vector<32x128xf32>, vector<2x128xf32> -> vector<2x128xf32>
    %301 = vector.extract_strided_slice %298 {offsets = [32, 0], sizes = [16, 128], strides = [1, 1]} : vector<64x128xf32> to vector<16x128xf32>
    %cst_60 = arith.constant dense<0.000000e+00> : vector<2x128xf32>
    %302 = tpu.matmul %295, %301, %cst_60 {dimension_numbers = #tpu.dot_dimension_numbers<[1], [0], [0], [1], [0, 0, 1, 1], [], []>} : vector<2x16xf32>, vector<16x128xf32>, vector<2x128xf32> -> vector<2x128xf32>
    %303 = arith.addf %300, %302 : vector<2x128xf32>
    %304 = vector.extract_strided_slice %298 {offsets = [48, 0], sizes = [16, 128], strides = [1, 1]} : vector<64x128xf32> to vector<16x128xf32>
    %cst_61 = arith.constant dense<0.000000e+00> : vector<2x128xf32>
    %305 = tpu.matmul %296, %304, %cst_61 {dimension_numbers = #tpu.dot_dimension_numbers<[1], [0], [0], [1], [0, 0, 1, 1], [], []>} : vector<2x16xf32>, vector<16x128xf32>, vector<2x128xf32> -> vector<2x128xf32>
    %306 = arith.addf %303, %305 : vector<2x128xf32>
    %c0_62 = arith.constant 0 : index
    %c0_63 = arith.constant 0 : index
    %307 = vector.load %arg11[%c0_62, %c0_63] : memref<1x128xf32, #tpu.memory_space<vmem>>, vector<1x128xf32>
    %308 = vector.broadcast %307 : vector<1x128xf32> to vector<2x128xf32>
    %309 = arith.addf %306, %308 : vector<2x128xf32>
    %cst_64 = arith.constant 0.000000e+00 : f32
    %310 = vector.broadcast %cst_64 : f32 to vector<2x128xf32>
    %311 = arith.maximumf %309, %310 : vector<2x128xf32>
    %c0_65 = arith.constant 0 : index
    %c0_66 = arith.constant 0 : index
    %312 = vector.load %arg12[%c0_65, %c0_66] : memref<128x128xf32, #tpu.memory_space<vmem>>, vector<128x128xf32>
    %cst_67 = arith.constant dense<0.000000e+00> : vector<2x128xf32>
    %313 = tpu.matmul %311, %312, %cst_67 {dimension_numbers = #tpu.dot_dimension_numbers<[1], [0], [0], [1], [0, 0, 1, 1], [], []>} : vector<2x128xf32>, vector<128x128xf32>, vector<2x128xf32> -> vector<2x128xf32>
    %c0_68 = arith.constant 0 : index
    %c0_69 = arith.constant 0 : index
    %314 = vector.load %arg13[%c0_68, %c0_69] : memref<1x128xf32, #tpu.memory_space<vmem>>, vector<1x128xf32>
    %315 = vector.broadcast %314 : vector<1x128xf32> to vector<2x128xf32>
    %316 = arith.addf %313, %315 : vector<2x128xf32>
    %cst_70 = arith.constant 0.000000e+00 : f32
    %317 = vector.broadcast %cst_70 : f32 to vector<2x128xf32>
    %318 = arith.maximumf %316, %317 : vector<2x128xf32>
    %c0_71 = arith.constant 0 : index
    %c0_72 = arith.constant 0 : index
    %319 = vector.load %arg14[%c0_71, %c0_72] : memref<128x4xf32, #tpu.memory_space<vmem>>, vector<128x4xf32>
    %cst_73 = arith.constant dense<0.000000e+00> : vector<2x4xf32>
    %320 = tpu.matmul %318, %319, %cst_73 {dimension_numbers = #tpu.dot_dimension_numbers<[1], [0], [0], [1], [0, 0, 1, 1], [], []>} : vector<2x128xf32>, vector<128x4xf32>, vector<2x4xf32> -> vector<2x4xf32>
    %c0_74 = arith.constant 0 : index
    %c0_75 = arith.constant 0 : index
    %321 = vector.load %arg15[%c0_74, %c0_75] : memref<1x4xf32, #tpu.memory_space<vmem>>, vector<1x4xf32>
    %322 = vector.broadcast %321 : vector<1x4xf32> to vector<2x4xf32>
    %323 = arith.addf %320, %322 : vector<2x4xf32>
    %324 = vector.extract_strided_slice %323 {offsets = [0, 0], sizes = [2, 1], strides = [1, 1]} : vector<2x4xf32> to vector<2x1xf32>
    %c0_76 = arith.constant 0 : index
    %c0_77 = arith.constant 0 : index
    %325 = vector.load %arg16[%c0_76, %c0_77] : memref<2x1xf32, #tpu.memory_space<vmem>>, vector<2x1xf32>
    tpu.vector_store %arg16[%c0_76, %c0_77], %324 {strides = array<i32>} : memref<2x1xf32, #tpu.memory_space<vmem>>, vector<2x1xf32>,
    %326 = vector.extract_strided_slice %323 {offsets = [0, 1], sizes = [2, 1], strides = [1, 1]} : vector<2x4xf32> to vector<2x1xf32>
    %c0_78 = arith.constant 0 : index
    %c0_79 = arith.constant 0 : index
    %327 = vector.load %arg17[%c0_78, %c0_79] : memref<2x1xf32, #tpu.memory_space<vmem>>, vector<2x1xf32>
    tpu.vector_store %arg17[%c0_78, %c0_79], %326 {strides = array<i32>} : memref<2x1xf32, #tpu.memory_space<vmem>>, vector<2x1xf32>,
    %328 = vector.extract_strided_slice %323 {offsets = [0, 2], sizes = [2, 1], strides = [1, 1]} : vector<2x4xf32> to vector<2x1xf32>
    %c0_80 = arith.constant 0 : index
    %c0_81 = arith.constant 0 : index
    %329 = vector.load %arg18[%c0_80, %c0_81] : memref<2x1xf32, #tpu.memory_space<vmem>>, vector<2x1xf32>
    tpu.vector_store %arg18[%c0_80, %c0_81], %328 {strides = array<i32>} : memref<2x1xf32, #tpu.memory_space<vmem>>, vector<2x1xf32>,
    %330 = vector.extract_strided_slice %323 {offsets = [0, 3], sizes = [2, 1], strides = [1, 1]} : vector<2x4xf32> to vector<2x1xf32>
    %c0_82 = arith.constant 0 : index
    %c0_83 = arith.constant 0 : index
    %331 = vector.load %arg19[%c0_82, %c0_83] : memref<2x1xf32, #tpu.memory_space<vmem>>, vector<2x1xf32>
    tpu.vector_store %arg19[%c0_82, %c0_83], %330 {strides = array<i32>} : memref<2x1xf32, #tpu.memory_space<vmem>>, vector<2x1xf32>,
    return
  }
}

</mosaic_0001>

<bundles_post_ra>
// kernel: msa_gb_forward.1
= control target key start
LH: loop header
LB: loop body
LE: loop exit
PB: predicated region body
PF: predicated region fallthrough
CT: control target
= control target key end

     0   :  { %s2288_s0 = inlined_call_operand.vmem [shape: f32[2,32], index: 0, kind: input, shape index: {}]   ;;  %s2289_s1 = inlined_call_operand.vmem [shape: f32[2,8,16], index: 1, kind: input, shape index: {}]   ;;  %s2290_s2 = inlined_call_operand.vmem [shape: f32[2,8,12], index: 2, kind: input, shape index: {}]   ;;  %s2291_s3 = inlined_call_operand.vmem [shape: s32[2,2], index: 3, kind: input, shape index: {}]   ;;  %s2292_s4 = inlined_call_operand.vmem [shape: f32[12,128], index: 4, kind: input, shape index: {}]   ;;  %s2293_s5 = inlined_call_operand.hbm [shape: f32[16,128], index: 5, kind: input, shape index: {}]   ;;  %s2294_s6 = inlined_call_operand.hbm [shape: f32[32,128], index: 6, kind: input, shape index: {}]   ;;  %s2295_s7 = inlined_call_operand.vmem [shape: f32[1,128], index: 7, kind: input, shape index: {}]   ;;  %s2296_s8 = inlined_call_operand.hbm [shape: f32[32,32], index: 8, kind: input, shape index: {}]   ;;  %s2297_s9 = inlined_call_operand.vmem [shape: f32[1,32], index: 9, kind: input, shape index: {}]   ;;  %s2298_s10 = inlined_call_operand.hbm [shape: f32[64,128], index: 10, kind: input, shape index: {}]   ;;  %s2299_s11 = inlined_call_operand.vmem [shape: f32[1,128], index: 11, kind: input, shape index: {}]   ;;  %s2300_s12 = inlined_call_operand.hbm [shape: f32[128,128], index: 12, kind: input, shape index: {}]   ;;  %s2301_s13 = inlined_call_operand.vmem [shape: f32[1,128], index: 13, kind: input, shape index: {}]   ;;  %s2302_s14 = inlined_call_operand.hbm [shape: f32[128,4], index: 14, kind: input, shape index: {}]   ;;  %s2303_s15 = inlined_call_operand.vmem [shape: f32[1,4], index: 15, kind: input, shape index: {}]   ;;  %s2304_s16 = inlined_call_operand.vmem [shape: f32[2,1], index: 16, kind: output, shape index: {0}]   ;;  %s2305_s17 = inlined_call_operand.vmem [shape: f32[2,1], index: 17, kind: output, shape index: {1}]   ;;  %s2306_s18 = inlined_call_operand.vmem [shape: f32[2,1], index: 18, kind: output, shape index: {2}]   ;;  %s2307_s19 = inlined_call_operand.vmem [shape: f32[2,1], index: 19, kind: output, shape index: {3}]  }
   0x1   :  { %2310 = sst [smem:[#allocation16_spill]] %s2288_s0 }
   0x2   :  { %2311 = sst [smem:[#allocation17_spill]] %s2289_s1 }
   0x3   :  { %2312 = sst [smem:[#allocation18_spill]] %s2290_s2 }
   0x4   :  { %2313 = sst [smem:[#allocation19_spill]] %s2291_s3 }
   0x5   :  { %25 = vsyncpa [#allocation3], 0 }
   0x6   :  { %26 = vsyncpa [#allocation5], 0 }
   0x7   :  { %27 = vsyncpa [#allocation8], 0 }
   0x8   :  { %28 = vsyncpa [#allocation11], 0  ;;  %s56_s20 = sshll.u32 %s2294_s6, 4  ;;  %s1848_s21 = smov [#allocation4]   ;;  %s57_s20 = int_to_ptr.hbm [resolvable:$true] %s56_s20 }
   0x9   :  { %s58_s1 = sshll.u32 %s1848_s21, 4  ;;  %s86_s23 = sshll.u32 %s2298_s10, 4  ;;  %s59_s1 = int_to_ptr.vmem [resolvable:$true] %s58_s1  ;;  %s87_s23 = int_to_ptr.hbm [resolvable:$true] %s86_s23 }
   0xa   :  { %s1849_s24 = smov 128   ;;  %s1850_s25 = smov 8  }
   0xb   :  { %64 = dma.hbm_to_vmem [thread:$0]  %s57_s20, 512, %s59_s1, [#allocation5], %s1849_s24, %s1849_s24, %s1850_s25  }
   0xc   :  { %s1851_s3 = smov [#allocation7]   ;;  %s43_s6 = sshll.u32 %s2293_s5, 4  ;;  %s44_s6 = int_to_ptr.hbm [resolvable:$true] %s43_s6 }
   0xd   :  { %s88_s26 = sshll.u32 %s1851_s3, 4  ;;  %s71_s0 = sshll.u32 %s2296_s8, 4  ;;  %s89_s26 = int_to_ptr.vmem [resolvable:$true] %s88_s26  ;;  %s72_s0 = int_to_ptr.hbm [resolvable:$true] %s71_s0 }
   0xe   :  { %94 = dma.hbm_to_vmem [thread:$0]  %s87_s23, 1024, %s89_s26, [#allocation8], %s1849_s24, %s1849_s24, %s1850_s25  }
   0xf   :  { %s1852_s30 = smov [#allocation2]   ;;  %s1853_s20 = smov [#allocation6]  }
  0x10   :  { %s45_s21 = sshll.u32 %s1852_s30, 4  ;;  %s73_s5 = sshll.u32 %s1853_s20, 4  ;;  %s46_s21 = int_to_ptr.vmem [resolvable:$true] %s45_s21  ;;  %s74_s5 = int_to_ptr.vmem [resolvable:$true] %s73_s5 }
  0x11   :  { %51 = dma.hbm_to_vmem [thread:$0]  %s44_s6, 256, %s46_s21, [#allocation3], %s1849_s24, %s1849_s24, %s1850_s25  }
  0x12   :  { %s101_s2 = sshll.u32 %s2300_s12, 4  ;;  %s116_s3 = sshll.u32 %s2302_s14, 4  ;;  %s102_s2 = int_to_ptr.hbm [resolvable:$true] %s101_s2  ;;  %s117_s3 = int_to_ptr.hbm [resolvable:$true] %s116_s3 }
  0x13   :  { %79 = dma.hbm_to_vmem [thread:$0]  %s72_s0, 512, %s74_s5, [#allocation5], %s1849_s24, %s1849_s24, %s1850_s25  }
  0x14   :  { %s1854_s26 = smov [#allocation9]   ;;  %s1855_s28 = smov [#allocation10]  }
  0x15   :  { %s103_s27 = sshll.u32 %s1854_s26, 4  ;;  %s118_s12 = sshll.u32 %s1855_s28, 4  ;;  %s104_s27 = int_to_ptr.vmem [resolvable:$true] %s103_s27  ;;  %s119_s12 = int_to_ptr.vmem [resolvable:$true] %s118_s12 }
  0x16   :  { %109 = dma.hbm_to_vmem [thread:$0]  %s102_s2, 2048, %s104_s27, [#allocation8], %s1849_s24, %s1849_s24, %s1850_s25  }
  0x17   :  { %124 = dma.hbm_to_vmem [thread:$0]  %s117_s3, 2048, %s119_s12, [#allocation11], %s1849_s24, %s1849_s24, %s1850_s25  }
  0x18   :  { %1840 = dma.done.wait [#allocation3], 256  }
  0x19   :  { %1841 = vsyncadd [#allocation3], 4294967040 }
  0x1a   :  { %1842 = dma.done.wait [#allocation5], 1024  }
  0x1b   :  { %1843 = vsyncadd [#allocation5], 4294966272 }
  0x1c   :  { %1844 = dma.done.wait [#allocation8], 3072  }
  0x1d   :  { %1845 = vsyncadd [#allocation8], 4294964224 }
  0x1e   :  { %1846 = dma.done.wait [#allocation11], 2048  }
  0x1f   :  { %1847 = vsyncadd [#allocation11], 4294965248  ;;  %vm196_vm0 = vcmask 1043456   ;;  %v158_v0 = vld [vmem:[#allocation2 + $0x8] sm:$0xff]  ;;  %v157_v2 = vld [vmem:[#allocation2] sm:$0xff]  ;;  %s2314_s0 = sld [smem:[#allocation17_spill]] }
  0x20   :  { %v156_v1 = vld [vmem:[%s2292_s4 + $0x8] sm:$0xf]  ;;  %180 = vmatpush.msra.mxu2 %v158_v0  ;;  %v155_v3 = vld [vmem:[%s2292_s4] sm:$0xff]  ;;  %vm159_vm1 = vcmask 130048   ;;  %s2315_s20 = sld [smem:[#allocation18_spill]]  ;;  %vm189_vm2 = vcmask 97280  }
  0x21   :  { %1512 = vmatpush.msk.msra.mxu3 %vm196_vm0, %v156_v1  ;;  %v2014_v6 = vld [vmem:[#allocation4 + $0x18] sm:$0xff]  ;;  %v2016_v7 = vld [vmem:[#allocation4 + $0x10] sm:$0xff]  ;;  %v2022_v8 = vld [vmem:[#allocation4 + $0x8] sm:$0xff]  ;;  %v1856_v12 = vmov 0.0   ;;  %s1857_s23 = smov 64   ;;  %v1859_v58 = vmov 1  }
  0x22   :  { %181 = vmatpush.msra.mxu2 %v157_v2  ;;  %773 = vmatpush.msra.mxu0 %v2014_v6  ;;  %v2028_v9 = vld [vmem:[#allocation4] sm:$0xff]  ;;  %v1563_v18 = vld [vmem:[%s2295_s7] ss:$0 sm:$0xff]  ;;  %s1858_s7 = smov 32   ;;  %s2316_s27 = sld [smem:[#allocation19_spill]]  ;;  %v1860_v60 = vmov 0  }
  0x23   :  { %215 = vmatpush.msra.mxu3 %v155_v3  ;;  %905 = vmatpush.msra.mxu1 %v2014_v6  ;;  %vm352_vm11 = vcmask 1041409   ;;  %s1861_s28 = smov 96   ;;  %vm244_vm14 = vcmask 261120   ;;  %s2317_s6 = sld [smem:[#allocation16_spill]] }
  0x24   :  { %260 = vmatpush.msrb.mxu2 %v2014_v6  ;;  %774 = vmatpush.msra.mxu0 %v2016_v7  ;;  %s1862_s24 = smov 112   ;;  %s1864_s4 = smov 126  }
  0x25   :  { %v153_v4 = vld [vmem:[%s2314_s0] sm:$0xff]  ;;  %381 = vmatpush.msrb.mxu3 %v2014_v6  ;;  %906 = vmatpush.msra.mxu1 %v2016_v7  ;;  %v154_v10 = vld [vmem:[%s2314_s0 + $0x8] sm:$0xff] }
  0x26   :  { %v151_v5 = vld [vmem:[%s2315_s20] sm:$0xff]  ;;  %1510 = vmatmul.msk.f32.vlgmr.msra.gmra.mxu2 %vm159_vm1, %v153_v4  ;;  %v152_v11 = vld [vmem:[%s2315_s20 + $0x8] sm:$0xff]  ;;  %775 = vmatpush.msra.mxu0 %v2022_v8  ;;  %s1863_s20 = smov 125  }
  0x27   :  { %1513 = vmatmul.msk.f32.vlgmr.msra.gmra.mxu3 %vm189_vm2, %v151_v5  ;;  %261 = vmatpush.msrb.mxu2 %v2016_v7 }
  0x28   :  { %382 = vmatpush.msrb.mxu3 %v2016_v7  ;;  %907 = vmatpush.msra.mxu1 %v2022_v8  ;;  %v233_v59 = vld [vmem:[%s2316_s27] sm:$0x3] }
  0x29   :  { %262 = vmatpush.msrb.mxu2 %v2022_v8  ;;  %776 = vmatpush.msra.mxu0 %v2028_v9 }
  0x2a   :  { %383 = vmatpush.msrb.mxu3 %v2022_v8  ;;  %908 = vmatpush.msra.mxu1 %v2028_v9 }
  0x2b   :  { %263 = vmatpush.msrb.mxu2 %v2028_v9  ;;  %1561 = vset.pattern.permute.xlu1 %v1859_v58 }
  0x2c   :  { %384 = vmatpush.msrb.mxu3 %v2028_v9  ;;  %1560 = vset.pattern.permute.xlu0 %v1860_v60 }
  0x2d   :  { %509 = vmatpush.msra.mxu2 %v2014_v6 }
  0x2e   :  { %1511 = vmatmul.msk.f32.gmra.mxu2 %vm159_vm1, %v154_v10  ;;  %641 = vmatpush.msra.mxu3 %v2014_v6 }
  0x2f   :  { %1514 = vmatmul.msk.f32.gmra.mxu3 %vm189_vm2, %v152_v11  ;;  %510 = vmatpush.msra.mxu2 %v2016_v7 }
  0x30   :  { %642 = vmatpush.msra.mxu3 %v2016_v7 }
  0x31   :  { %511 = vmatpush.msra.mxu2 %v2022_v8 }
  0x32   :  { %643 = vmatpush.msra.mxu3 %v2022_v8 }
  0x33   :  { %512 = vmatpush.msra.mxu2 %v2028_v9 }
  0x34   :  { %644 = vmatpush.msra.mxu3 %v2028_v9 }
  0x36   :  { %264 = vmatmul.f32.vlgmr.msrb.gmra.mxu2 %v1856_v12 }
  0x37   :  { %1037 = vmatpush.msrb.mxu2 %v2014_v6 }
  0x39   :  { %1038 = vmatpush.msrb.mxu2 %v2016_v7 }
  0x3b   :  { %1039 = vmatpush.msrb.mxu2 %v2022_v8 }
  0x3d   :  { %1040 = vmatpush.msrb.mxu2 %v2028_v9 }
  0xa9   :  { %v183_v13 = vpop.f32.mrf.mxu2 }
  0xaa   :  { %v217_v14 = vpop.f32.mrf.mxu3 }
  0xab   :  { %v218_v23 = vadd.f32 %v217_v14, %v183_v13 }
  0xad   :  { %v2066_v24 = vadd.f32 %v1563_v18, %v218_v23 }
  0xb1   :  { %v186_v15 = vpop.f32.mrf.mxu2 }
  0xb2   :  { %v220_v16 = vpop.f32.mrf.mxu3 }
  0xb3   :  { %v221_v17 = vadd.f32 %v220_v16, %v186_v15  ;;  %v234_v16 = vlaneseq }
  0xb5   :  { %v2063_v20 = vadd.f32 %v1563_v18, %v221_v17  ;;  %v235_v18 = vand.u32 127, %v234_v16 }
  0xb7   :  { %vm236_vm12 = vcmp.lt.s32.totalorder %v235_v18, 16 }
  0xb9   :  { %v265_v19 = vpop.f32.mrf.mxu2 }
  0xba   :  { %v269_v21 = vrot.slane %v265_v19, 1  ;;  %v272_v25 = vadd.f32 %v265_v19, %v2066_v24 }
  0xbc   :  { %v273_v22 = vadd.f32 %v269_v21, %v2063_v20  ;;  %v1515_v29 = vmul.f32 -1.442695, %v272_v25 }
  0xbe   :  { %1568 = vtanh.f32 %v273_v22  ;;  %v1516_v28 = vmul.f32 -1.442695, %v273_v22 }
  0xbf   :  { %1570 = vtanh.f32 %v272_v25 }
  0xc0   :  { %1572 = vpow2.f32 %v1516_v28 }
  0xc1   :  { %1574 = vpow2.f32 %v1515_v29 }
  0xc4   :  { %v1569_v26 = vpop.eup %1568 }
  0xc5   :  { %320 = vrot.lane.b32.xlu0 %v1569_v26, %s1857_s23  ;;  %v1571_v27 = vpop.eup %1570 }
  0xc6   :  { %v1573_v30 = vpop.eup %1572 }
  0xc7   :  { %v281_v31 = vadd.f32 1.0, %v1573_v30  ;;  %v1575_v32 = vpop.eup %1574 }
  0xc8   :  { %v280_v33 = vadd.f32 1.0, %v1575_v32 }
  0xc9   :  { %1576 = vrcp.f32 %v281_v31  ;;  %v308_v42 = vand.u32 2147483648, %v281_v31  ;;  %vm302_vm4 = vweird.f32 %v281_v31  ;;  %v306_v43 = vand.u32 2147483647, %v281_v31 }
  0xca   :  { %1578 = vrcp.f32 %v280_v33  ;;  %v293_v51 = vand.u32 2147483648, %v280_v33  ;;  %vm287_vm8 = vweird.f32 %v280_v33  ;;  %v291_v52 = vand.u32 2147483647, %v280_v33 }
  0xcb   :  { %v309_v46 = vor.u32 1.1754944e-38, %v308_v42  ;;  %vm307_vm6 = vcmp.eq.f32.partialorder %v306_v43, 8.507059e+37 }
  0xcc   :  { %v294_v54 = vor.u32 1.1754944e-38, %v293_v51  ;;  %vm292_vm10 = vcmp.eq.f32.partialorder %v291_v52, 8.507059e+37 }
  0xcd   :  { %318 = vrot.lane.b32.xlu0 %v1571_v27, %s1857_s23 }
  0xcf   :  { %v1577_v34 = vpop.eup %1576 }
  0xd0   :  { %v298_v35 = vmul.f32 %v1577_v34, %v281_v31  ;;  %v1579_v37 = vpop.eup %1578  ;;  %vm303_vm3 = vweird.f32 %v1577_v34 }
  0xd1   :  { %v283_v39 = vmul.f32 %v1579_v37, %v280_v33  ;;  %vm304_vm5 = vmor %vm302_vm4, %vm303_vm3  ;;  %vm288_vm7 = vweird.f32 %v1579_v37 }
  0xd2   :  { %v299_v36 = vsub.f32 1.0, %v298_v35  ;;  %vm289_vm9 = vmor %vm287_vm8, %vm288_vm7 }
  0xd3   :  { %v284_v41 = vsub.f32 1.0, %v283_v39 }
  0xd4   :  { %v300_v38 = vmul.f32 %v1577_v34, %v299_v36 }
  0xd5   :  { %v285_v45 = vmul.f32 %v1579_v37, %v284_v41  ;;  %238 = vperm.xlu0 %1560, %v233_v59  }
  0xd6   :  { %v301_v40 = vadd.f32 %v1577_v34, %v300_v38 }
  0xd7   :  { %v286_v50 = vadd.f32 %v1579_v37, %v285_v45 }
  0xd8   :  { %v305_v44 = vsel %vm304_vm5, %v1577_v34, %v301_v40 }
  0xd9   :  { %v310_v48 = vsel %vm307_vm6, %v309_v46, %v305_v44  ;;  %v290_v53 = vsel %vm289_vm9, %v1579_v37, %v286_v50 }
  0xda   :  { %v295_v56 = vsel %vm292_vm10, %v294_v54, %v290_v53  ;;  %v315_v61 = vmul.f32 0.0, %v310_v48 }
  0xdb   :  { %v314_v0 = vmul.f32 0.0, %v295_v56 }
  0xdd   :  { %1562 = vset.pattern.permute.xlu0 %v1859_v58 }
 0x137   :  { %v321_v47 = vpop.permute.xlu0 %320 }
 0x138   :  { %v325_v49 = vmul.f32 %v321_v47, %v310_v48 }
 0x13a   :  { %330 = vrot.lane.b32.xlu1 %v325_v49, %s1858_s7 }
 0x13f   :  { %v319_v55 = vpop.permute.xlu0 %318 }
 0x140   :  { %v324_v57 = vmul.f32 %v319_v55, %v295_v56 }
 0x142   :  { %328 = vrot.lane.b32.xlu1 %v324_v57, %s1858_s7 }
 0x147   :  { %v239_v21 = vpop.permute.xlu0 %238 }
 0x14a   :  { %241 = vperm.xlu1 %1561, %v233_v59  }
 0x1ac   :  { %v331_v62 = vpop.permute.xlu1 %330 }
 0x1ad   :  { %v335_v63 = vadd.f32 %v331_v62, %v315_v61 }
 0x1af   :  { %1580 = vtanh.f32 %v335_v63  ;;  %v360_v3 = vrot.slane %v335_v63, 7 }
 0x1b4   :  { %v329_v1 = vpop.permute.xlu1 %328 }
 0x1b5   :  { %v1581_v2 = vpop.eup %1580  ;;  %v334_v4 = vadd.f32 %v329_v1, %v314_v0 }
 0x1b6   :  { %342 = vrot.lane.b32.xlu2 %v1581_v2, %s1857_s23 }
 0x1b7   :  { %1582 = vtanh.f32 %v334_v4  ;;  %v361_v5 = vsel %vm352_vm11, %v360_v3, %v334_v4 }
 0x1b8   :  { %362 = vrot.lane.b32.xlu1 %v361_v5, %s1861_s28 }
 0x1bc   :  { %v242_v19 = vpop.permute.xlu1 %241 }
 0x1bd   :  { %v1583_v10 = vpop.eup %1582  ;;  %v2082_v22 = vsel %vm236_vm12, %v239_v21, %v242_v19 }
 0x1be   :  { %340 = vrot.lane.b32.xlu2 %v1583_v10, %s1857_s23  ;;  %vm348_vm13 = vcmp.gt.s32.totalorder %v2082_v22, 0  ;;  %vm477_vm8 = vcmp.gt.s32.totalorder %v2082_v22, 1 }
 0x210   :  { %v343_v11 = vpop.permute.xlu2 %342 }
 0x211   :  { %v347_v12 = vmul.f32 %v343_v11, %v310_v48 }
 0x213   :  { %v351_v14 = vrot.slane %v347_v12, 7 }
 0x218   :  { %v341_v13 = vpop.permute.xlu2 %340 }
 0x219   :  { %v346_v15 = vmul.f32 %v341_v13, %v295_v56 }
 0x21b   :  { %v353_v17 = vsel %vm352_vm11, %v351_v14, %v346_v15 }
 0x21c   :  { %354 = vrot.lane.b32.xlu2 %v353_v17, %s1858_s7 }
 0x22a   :  { %v363_v23 = vpop.permute.xlu1 %362 }
 0x22b   :  { %v2085_v25 = vsel %vm348_vm13, %v363_v23, 0.0 }
 0x22c   :  { %v436_v26 = vrot.slane %v2085_v25, 7 }
 0x22e   :  { %437 = vrot.lane.b32.xlu1 %v436_v26, %s1858_s7 }
 0x276   :  { %v355_v27 = vpop.permute.xlu2 %354 }
 0x277   :  { %v2089_v28 = vsel %vm348_vm13, %v355_v27, 0.0 }
 0x278   :  { %1517 = vmatmul.msk.f32.vlgmr.msrb.gmra.mxu3 %vm244_vm14, %v2089_v28 }
 0x279   :  { %1169 = vmatpush.msrb.mxu3 %v2014_v6 }
 0x27b   :  { %1170 = vmatpush.msrb.mxu3 %v2016_v7 }
 0x27d   :  { %1171 = vmatpush.msrb.mxu3 %v2022_v8 }
 0x27f   :  { %1172 = vmatpush.msrb.mxu3 %v2028_v9 }
 0x2a0   :  { %v438_v61 = vpop.permute.xlu1 %437 }
 0x2fb   :  { %v386_v29 = vpop.f32.mrf.mxu3 }
 0x2fc   :  { %v390_v30 = vrot.slane %v386_v29, 7  ;;  %v394_v31 = vadd.f32 %v386_v29, %v2063_v20 }
 0x2fe   :  { %v393_v32 = vadd.f32 %v390_v30, %v2066_v24  ;;  %1584 = vtanh.f32 %v394_v31  ;;  %v1519_v9 = vmul.f32 -1.442695, %v394_v31 }
 0x300   :  { %1586 = vtanh.f32 %v393_v32  ;;  %v1518_v6 = vmul.f32 -1.442695, %v393_v32 }
 0x302   :  { %1588 = vpow2.f32 %v1518_v6 }
 0x304   :  { %v1585_v33 = vpop.eup %1584 }
 0x305   :  { %449 = vrot.lane.b32.xlu0 %v1585_v33, %s1857_s23 }
 0x306   :  { %v1587_v34 = vpop.eup %1586 }
 0x307   :  { %447 = vrot.lane.b32.xlu2 %v1587_v34, %s1857_s23 }
 0x308   :  { %v1589_v7 = vpop.eup %1588 }
 0x309   :  { %v401_v8 = vadd.f32 1.0, %v1589_v7 }
 0x30b   :  { %1590 = vrcp.f32 %v401_v8  ;;  %v414_v42 = vand.u32 2147483648, %v401_v8  ;;  %vm408_vm0 = vweird.f32 %v401_v8  ;;  %v412_v43 = vand.u32 2147483647, %v401_v8 }
 0x30c   :  { %1592 = vpow2.f32 %v1519_v9 }
 0x30d   :  { %v415_v45 = vor.u32 1.1754944e-38, %v414_v42  ;;  %vm413_vm3 = vcmp.eq.f32.partialorder %v412_v43, 8.507059e+37 }
 0x30f   :  { %439 = vrot.lane.b32.xlu2 %v2085_v25, %s1858_s7 }
 0x311   :  { %v1591_v35 = vpop.eup %1590 }
 0x312   :  { %v404_v36 = vmul.f32 %v1591_v35, %v401_v8  ;;  %v1593_v38 = vpop.eup %1592  ;;  %vm409_vm15 = vweird.f32 %v1591_v35 }
 0x313   :  { %v402_v39 = vadd.f32 1.0, %v1593_v38  ;;  %vm410_vm2 = vmor %vm408_vm0, %vm409_vm15 }
 0x314   :  { %v405_v37 = vsub.f32 1.0, %v404_v36 }
 0x315   :  { %1594 = vrcp.f32 %v402_v39  ;;  %v429_v54 = vand.u32 2147483648, %v402_v39  ;;  %vm423_vm5 = vweird.f32 %v402_v39  ;;  %v427_v55 = vand.u32 2147483647, %v402_v39 }
 0x316   :  { %v406_v40 = vmul.f32 %v1591_v35, %v405_v37 }
 0x317   :  { %v430_v57 = vor.u32 1.1754944e-38, %v429_v54  ;;  %vm428_vm7 = vcmp.eq.f32.partialorder %v427_v55, 8.507059e+37 }
 0x318   :  { %v407_v41 = vadd.f32 %v1591_v35, %v406_v40 }
 0x31a   :  { %v411_v44 = vsel %vm410_vm2, %v1591_v35, %v407_v41 }
 0x31b   :  { %v1595_v46 = vpop.eup %1594  ;;  %v416_v48 = vsel %vm413_vm3, %v415_v45, %v411_v44 }
 0x31c   :  { %v419_v50 = vmul.f32 %v1595_v46, %v402_v39  ;;  %vm424_vm4 = vweird.f32 %v1595_v46  ;;  %v443_v62 = vmul.f32 %v438_v61, %v416_v48 }
 0x31d   :  { %vm425_vm6 = vmor %vm423_vm5, %vm424_vm4  ;;  %vm607_vm4 = vcmp.gt.s32.totalorder %v2082_v22, 2 }
 0x31e   :  { %v420_v51 = vsub.f32 1.0, %v419_v50 }
 0x320   :  { %v421_v52 = vmul.f32 %v1595_v46, %v420_v51 }
 0x322   :  { %v422_v53 = vadd.f32 %v1595_v46, %v421_v52 }
 0x324   :  { %v426_v56 = vsel %vm425_vm6, %v1595_v46, %v422_v53 }
 0x325   :  { %v431_v58 = vsel %vm428_vm7, %v430_v57, %v426_v56 }
 0x361   :  { %v448_v47 = vpop.permute.xlu2 %447 }
 0x362   :  { %v453_v49 = vmul.f32 %v448_v47, %v416_v48 }
 0x364   :  { %457 = vrot.lane.b32.xlu0 %v453_v49, %s1858_s7 }
 0x369   :  { %v440_v2 = vpop.permute.xlu2 %439 }
 0x36a   :  { %v444_v3 = vmul.f32 %v440_v2, %v431_v58 }
 0x377   :  { %v450_v59 = vpop.permute.xlu0 %449 }
 0x378   :  { %v454_v60 = vmul.f32 %v450_v59, %v431_v58 }
 0x37a   :  { %459 = vrot.lane.b32.xlu1 %v454_v60, %s1858_s7 }
 0x3d6   :  { %v458_v63 = vpop.permute.xlu0 %457 }
 0x3d7   :  { %v463_v0 = vadd.f32 %v458_v63, %v443_v62 }
 0x3d9   :  { %1596 = vtanh.f32 %v463_v0  ;;  %v488_v5 = vrot.slane %v463_v0, 1 }
 0x3df   :  { %v1597_v1 = vpop.eup %1596 }
 0x3e0   :  { %469 = vrot.lane.b32.xlu2 %v1597_v1, %s1857_s23 }
 0x3ec   :  { %v460_v4 = vpop.permute.xlu1 %459 }
 0x3ed   :  { %v464_v10 = vadd.f32 %v460_v4, %v444_v3 }
 0x3ef   :  { %1598 = vtanh.f32 %v464_v10  ;;  %v489_v11 = vsel %vm352_vm11, %v464_v10, %v488_v5 }
 0x3f0   :  { %490 = vrot.lane.b32.xlu2 %v489_v11, %s1861_s28 }
 0x3f5   :  { %v1599_v12 = vpop.eup %1598 }
 0x3f6   :  { %471 = vrot.lane.b32.xlu0 %v1599_v12, %s1857_s23 }
 0x43a   :  { %v470_v13 = vpop.permute.xlu2 %469 }
 0x43b   :  { %v475_v17 = vmul.f32 %v470_v13, %v416_v48 }
 0x43d   :  { %v480_v19 = vrot.slane %v475_v17, 1 }
 0x44a   :  { %v491_v14 = vpop.permute.xlu2 %490 }
 0x44b   :  { %v2111_v15 = vsel %vm477_vm8, %v491_v14, %v2085_v25 }
 0x44c   :  { %v565_v16 = vrot.slane %v2111_v15, 6 }
 0x44e   :  { %567 = vrot.lane.b32.xlu2 %v565_v16, %s1858_s7 }
 0x468   :  { %v472_v18 = vpop.permute.xlu0 %471 }
 0x469   :  { %v476_v21 = vmul.f32 %v472_v18, %v431_v58 }
 0x46b   :  { %v481_v23 = vsel %vm352_vm11, %v476_v21, %v480_v19 }
 0x46c   :  { %482 = vrot.lane.b32.xlu1 %v481_v23, %s1858_s7 }
 0x4a8   :  { %v568_v61 = vpop.permute.xlu2 %567 }
 0x4de   :  { %v483_v26 = vpop.permute.xlu1 %482 }
 0x4df   :  { %v2118_v27 = vsel %vm477_vm8, %v483_v26, %v2089_v28  ;;  %v566_v28 = vrot.slane %v2111_v15, 7 }
 0x4e0   :  { %1520 = vmatmul.msk.f32.vlgmr.msra.gmra.mxu2 %vm244_vm14, %v2118_v27 }
 0x563   :  { %v514_v25 = vpop.f32.mrf.mxu2 }
 0x564   :  { %v518_v29 = vrot.slane %v514_v25, 6  ;;  %v519_v30 = vrot.slane %v514_v25, 7 }
 0x566   :  { %v522_v31 = vadd.f32 %v518_v29, %v2066_v24  ;;  %v523_v32 = vadd.f32 %v519_v30, %v2063_v20 }
 0x568   :  { %1600 = vtanh.f32 %v522_v31  ;;  %v1521_v6 = vmul.f32 -1.442695, %v522_v31  ;;  %v1522_v7 = vmul.f32 -1.442695, %v523_v32 }
 0x569   :  { %1602 = vtanh.f32 %v523_v32 }
 0x56a   :  { %1604 = vpow2.f32 %v1521_v6 }
 0x56b   :  { %1606 = vpow2.f32 %v1522_v7 }
 0x56e   :  { %v1601_v33 = vpop.eup %1600 }
 0x56f   :  { %v1603_v34 = vpop.eup %1602  ;;  %577 = vrot.lane.b32.xlu0 %v1601_v33, %s1857_s23 }
 0x570   :  { %579 = vrot.lane.b32.xlu1 %v1603_v34, %s1857_s23  ;;  %v1605_v8 = vpop.eup %1604 }
 0x571   :  { %v1607_v9 = vpop.eup %1606  ;;  %v530_v35 = vadd.f32 1.0, %v1605_v8 }
 0x572   :  { %v531_v36 = vadd.f32 1.0, %v1607_v9 }
 0x573   :  { %1608 = vrcp.f32 %v530_v35  ;;  %v543_v47 = vand.u32 2147483648, %v530_v35  ;;  %vm537_vm12 = vweird.f32 %v530_v35  ;;  %v541_v49 = vand.u32 2147483647, %v530_v35 }
 0x574   :  { %1610 = vrcp.f32 %v531_v36  ;;  %v558_v48 = vand.u32 2147483648, %v531_v36  ;;  %vm552_vm13 = vweird.f32 %v531_v36  ;;  %v556_v50 = vand.u32 2147483647, %v531_v36 }
 0x575   :  { %v544_v53 = vor.u32 1.1754944e-38, %v543_v47  ;;  %vm542_vm2 = vcmp.eq.f32.partialorder %v541_v49, 8.507059e+37 }
 0x576   :  { %v559_v54 = vor.u32 1.1754944e-38, %v558_v48  ;;  %vm557_vm3 = vcmp.eq.f32.partialorder %v556_v50, 8.507059e+37 }
 0x577   :  { %569 = vrot.lane.b32.xlu0 %v566_v28, %s1858_s7 }
 0x579   :  { %v1609_v37 = vpop.eup %1608 }
 0x57a   :  { %v1611_v38 = vpop.eup %1610  ;;  %v533_v39 = vmul.f32 %v1609_v37, %v530_v35  ;;  %vm538_vm9 = vweird.f32 %v1609_v37 }
 0x57b   :  { %v548_v40 = vmul.f32 %v1611_v38, %v531_v36  ;;  %vm553_vm10 = vweird.f32 %v1611_v38  ;;  %vm539_vm15 = vmor %vm537_vm12, %vm538_vm9 }
 0x57c   :  { %v534_v41 = vsub.f32 1.0, %v533_v39  ;;  %vm554_vm0 = vmor %vm552_vm13, %vm553_vm10 }
 0x57d   :  { %v549_v42 = vsub.f32 1.0, %v548_v40 }
 0x57e   :  { %v535_v43 = vmul.f32 %v1609_v37, %v534_v41 }
 0x57f   :  { %v550_v44 = vmul.f32 %v1611_v38, %v549_v42 }
 0x580   :  { %v536_v45 = vadd.f32 %v1609_v37, %v535_v43 }
 0x581   :  { %v551_v46 = vadd.f32 %v1611_v38, %v550_v44 }
 0x582   :  { %v540_v51 = vsel %vm539_vm15, %v1609_v37, %v536_v45  ;;  %vm739_vm15 = vcmp.gt.s32.totalorder %v2082_v22, 3 }
 0x583   :  { %v555_v52 = vsel %vm554_vm0, %v1611_v38, %v551_v46  ;;  %v545_v56 = vsel %vm542_vm2, %v544_v53, %v540_v51 }
 0x584   :  { %v560_v58 = vsel %vm557_vm3, %v559_v54, %v555_v52  ;;  %v573_v3 = vmul.f32 %v568_v61, %v545_v56 }
 0x5e1   :  { %v578_v55 = vpop.permute.xlu0 %577 }
 0x5e2   :  { %v580_v57 = vpop.permute.xlu1 %579  ;;  %v583_v59 = vmul.f32 %v578_v55, %v545_v56 }
 0x5e3   :  { %v584_v60 = vmul.f32 %v580_v57, %v560_v58 }
 0x5e4   :  { %587 = vrot.lane.b32.xlu1 %v583_v59, %s1858_s7 }
 0x5e5   :  { %589 = vrot.lane.b32.xlu2 %v584_v60, %s1858_s7 }
 0x5e9   :  { %v570_v62 = vpop.permute.xlu0 %569 }
 0x5ea   :  { %v574_v63 = vmul.f32 %v570_v62, %v560_v58 }
 0x63f   :  { %v590_v0 = vpop.permute.xlu2 %589 }
 0x640   :  { %v594_v1 = vadd.f32 %v590_v0, %v574_v63 }
 0x642   :  { %1612 = vtanh.f32 %v594_v1  ;;  %v620_v12 = vrot.slane %v594_v1, 1 }
 0x648   :  { %v1613_v2 = vpop.eup %1612 }
 0x649   :  { %601 = vrot.lane.b32.xlu1 %v1613_v2, %s1857_s23 }
 0x656   :  { %v588_v4 = vpop.permute.xlu1 %587 }
 0x657   :  { %v593_v5 = vadd.f32 %v588_v4, %v573_v3 }
 0x659   :  { %1614 = vtanh.f32 %v593_v5  ;;  %v619_v11 = vrot.slane %v593_v5, 2 }
 0x65b   :  { %v621_v13 = vsel %vm352_vm11, %v620_v12, %v619_v11 }
 0x65f   :  { %v1615_v10 = vpop.eup %1614 }
 0x660   :  { %599 = vrot.lane.b32.xlu0 %v1615_v10, %s1857_s23 }
 0x668   :  { %622 = vrot.lane.b32.xlu0 %v621_v13, %s1861_s28 }
 0x6bb   :  { %v602_v14 = vpop.permute.xlu1 %601 }
 0x6bc   :  { %v606_v16 = vmul.f32 %v602_v14, %v560_v58 }
 0x6be   :  { %v611_v19 = vrot.slane %v606_v16, 1 }
 0x6d2   :  { %v600_v17 = vpop.permute.xlu0 %599 }
 0x6d3   :  { %v605_v18 = vmul.f32 %v600_v17, %v545_v56 }
 0x6d5   :  { %v610_v21 = vrot.slane %v605_v18, 2 }
 0x6d7   :  { %v612_v23 = vsel %vm352_vm11, %v611_v19, %v610_v21 }
 0x6d8   :  { %613 = vrot.lane.b32.xlu2 %v612_v23, %s1858_s7 }
 0x6da   :  { %v623_v26 = vpop.permute.xlu0 %622 }
 0x6db   :  { %v2138_v25 = vsel %vm607_vm4, %v623_v26, %v2111_v15 }
 0x6dc   :  { %v697_v29 = vrot.slane %v2138_v25, 5 }
 0x6de   :  { %699 = vrot.lane.b32.xlu0 %v697_v29, %s1858_s7 }
 0x732   :  { %v614_v30 = vpop.permute.xlu2 %613 }
 0x733   :  { %v2143_v31 = vsel %vm607_vm4, %v614_v30, %v2118_v27  ;;  %v698_v27 = vrot.slane %v2138_v25, 6 }
 0x734   :  { %1523 = vmatmul.msk.f32.vlgmr.msra.gmra.mxu3 %vm244_vm14, %v2143_v31 }
 0x750   :  { %v700_v63 = vpop.permute.xlu0 %699 }
 0x7b7   :  { %v646_v32 = vpop.f32.mrf.mxu3 }
 0x7b8   :  { %v650_v33 = vrot.slane %v646_v32, 5  ;;  %v651_v34 = vrot.slane %v646_v32, 6 }
 0x7ba   :  { %v654_v28 = vadd.f32 %v650_v33, %v2066_v24  ;;  %v655_v6 = vadd.f32 %v651_v34, %v2063_v20 }
 0x7bc   :  { %1616 = vtanh.f32 %v654_v28  ;;  %v1525_v8 = vmul.f32 -1.442695, %v655_v6  ;;  %v1524_v37 = vmul.f32 -1.442695, %v654_v28 }
 0x7bd   :  { %1618 = vtanh.f32 %v655_v6 }
 0x7be   :  { %1620 = vpow2.f32 %v1525_v8 }
 0x7c2   :  { %v1617_v15 = vpop.eup %1616 }
 0x7c3   :  { %v1619_v7 = vpop.eup %1618  ;;  %709 = vrot.lane.b32.xlu1 %v1617_v15, %s1857_s23 }
 0x7c4   :  { %711 = vrot.lane.b32.xlu2 %v1619_v7, %s1857_s23  ;;  %v1621_v9 = vpop.eup %1620 }
 0x7c5   :  { %v663_v35 = vadd.f32 1.0, %v1621_v9 }
 0x7c7   :  { %1622 = vrcp.f32 %v663_v35  ;;  %v690_v44 = vand.u32 2147483648, %v663_v35  ;;  %vm684_vm6 = vweird.f32 %v663_v35  ;;  %v688_v45 = vand.u32 2147483647, %v663_v35 }
 0x7c8   :  { %1624 = vpow2.f32 %v1524_v37 }
 0x7c9   :  { %v691_v47 = vor.u32 1.1754944e-38, %v690_v44  ;;  %vm689_vm8 = vcmp.eq.f32.partialorder %v688_v45, 8.507059e+37 }
 0x7cb   :  { %701 = vrot.lane.b32.xlu1 %v698_v27, %s1858_s7 }
 0x7cd   :  { %v1623_v36 = vpop.eup %1622 }
 0x7ce   :  { %v680_v38 = vmul.f32 %v1623_v36, %v663_v35  ;;  %v1625_v40 = vpop.eup %1624  ;;  %vm685_vm5 = vweird.f32 %v1623_v36 }
 0x7cf   :  { %v662_v42 = vadd.f32 1.0, %v1625_v40  ;;  %vm686_vm7 = vmor %vm684_vm6, %vm685_vm5 }
 0x7d0   :  { %v681_v39 = vsub.f32 1.0, %v680_v38 }
 0x7d1   :  { %1626 = vrcp.f32 %v662_v42  ;;  %v675_v56 = vand.u32 2147483648, %v662_v42  ;;  %vm669_vm10 = vweird.f32 %v662_v42  ;;  %v673_v57 = vand.u32 2147483647, %v662_v42 }
 0x7d2   :  { %v682_v41 = vmul.f32 %v1623_v36, %v681_v39 }
 0x7d3   :  { %v676_v59 = vor.u32 1.1754944e-38, %v675_v56  ;;  %vm674_vm13 = vcmp.eq.f32.partialorder %v673_v57, 8.507059e+37 }
 0x7d4   :  { %v683_v43 = vadd.f32 %v1623_v36, %v682_v41 }
 0x7d6   :  { %v687_v46 = vsel %vm686_vm7, %v1623_v36, %v683_v43 }
 0x7d7   :  { %v692_v49 = vsel %vm689_vm8, %v691_v47, %v687_v46  ;;  %v1627_v50 = vpop.eup %1626 }
 0x7d8   :  { %v665_v52 = vmul.f32 %v1627_v50, %v662_v42  ;;  %vm670_vm9 = vweird.f32 %v1627_v50 }
 0x7d9   :  { %vm671_vm12 = vmor %vm669_vm10, %vm670_vm9  ;;  %vm871_vm9 = vcmp.gt.s32.totalorder %v2082_v22, 4 }
 0x7da   :  { %v666_v53 = vsub.f32 1.0, %v665_v52 }
 0x7dc   :  { %v667_v54 = vmul.f32 %v1627_v50, %v666_v53 }
 0x7de   :  { %v668_v55 = vadd.f32 %v1627_v50, %v667_v54 }
 0x7e0   :  { %v672_v58 = vsel %vm671_vm12, %v1627_v50, %v668_v55 }
 0x7e1   :  { %v677_v61 = vsel %vm674_vm13, %v676_v59, %v672_v58 }
 0x7e2   :  { %v705_v1 = vmul.f32 %v700_v63, %v677_v61 }
 0x81e   :  { %v712_v48 = vpop.permute.xlu2 %711 }
 0x81f   :  { %v716_v51 = vmul.f32 %v712_v48, %v692_v49 }
 0x821   :  { %721 = vrot.lane.b32.xlu0 %v716_v51, %s1858_s7 }
 0x835   :  { %v710_v60 = vpop.permute.xlu1 %709 }
 0x836   :  { %v715_v62 = vmul.f32 %v710_v60, %v677_v61 }
 0x838   :  { %719 = vrot.lane.b32.xlu2 %v715_v62, %s1858_s7 }
 0x83d   :  { %v702_v0 = vpop.permute.xlu1 %701 }
 0x83e   :  { %v706_v2 = vmul.f32 %v702_v0, %v692_v49 }
 0x892   :  { %v720_v3 = vpop.permute.xlu2 %719 }
 0x893   :  { %v722_v4 = vpop.permute.xlu0 %721  ;;  %v725_v5 = vadd.f32 %v720_v3, %v705_v1 }
 0x894   :  { %v726_v10 = vadd.f32 %v722_v4, %v706_v2 }
 0x895   :  { %1628 = vtanh.f32 %v725_v5  ;;  %v751_v14 = vrot.slane %v725_v5, 3 }
 0x896   :  { %1630 = vtanh.f32 %v726_v10  ;;  %v752_v13 = vrot.slane %v726_v10, 2 }
 0x898   :  { %v753_v16 = vsel %vm352_vm11, %v752_v13, %v751_v14 }
 0x89b   :  { %v1629_v11 = vpop.eup %1628 }
 0x89c   :  { %v1631_v12 = vpop.eup %1630  ;;  %731 = vrot.lane.b32.xlu1 %v1629_v11, %s1857_s23 }
 0x89d   :  { %733 = vrot.lane.b32.xlu2 %v1631_v12, %s1857_s23 }
 0x8a4   :  { %754 = vrot.lane.b32.xlu1 %v753_v16, %s1861_s28 }
 0x8f7   :  { %v734_v17 = vpop.permute.xlu2 %733 }
 0x8f8   :  { %v738_v18 = vmul.f32 %v734_v17, %v692_v49 }
 0x8fa   :  { %v743_v23 = vrot.slane %v738_v18, 2 }
 0x90e   :  { %v732_v19 = vpop.permute.xlu1 %731 }
 0x90f   :  { %v737_v21 = vmul.f32 %v732_v19, %v677_v61 }
 0x911   :  { %v742_v26 = vrot.slane %v737_v21, 3 }
 0x913   :  { %v744_v29 = vsel %vm352_vm11, %v743_v23, %v742_v26 }
 0x914   :  { %745 = vrot.lane.b32.xlu0 %v744_v29, %s1858_s7 }
 0x916   :  { %v755_v30 = vpop.permute.xlu1 %754 }
 0x917   :  { %v2163_v32 = vsel %vm739_vm15, %v755_v30, %v2138_v25 }
 0x918   :  { %v829_v33 = vrot.slane %v2163_v32, 4 }
 0x91a   :  { %831 = vrot.lane.b32.xlu1 %v829_v33, %s1858_s7 }
 0x986   :  { %v746_v34 = vpop.permute.xlu0 %745 }
 0x987   :  { %v2168_v28 = vsel %vm739_vm15, %v746_v34, %v2143_v31  ;;  %v830_v31 = vrot.slane %v2163_v32, 5 }
 0x988   :  { %1526 = vmatmul.msk.f32.vlgmr.msra.gmra.mxu0 %vm244_vm14, %v2168_v28 }
 0x98c   :  { %v832_v1 = vpop.permute.xlu1 %831 }
 0xa05   :  { %v778_v6 = vpop.f32.mrf.mxu0 }
 0xa06   :  { %v782_v15 = vrot.slane %v778_v6, 4  ;;  %v783_v7 = vrot.slane %v778_v6, 5 }
 0xa08   :  { %v786_v27 = vadd.f32 %v782_v15, %v2066_v24  ;;  %v787_v8 = vadd.f32 %v783_v7, %v2063_v20 }
 0xa0a   :  { %1632 = vtanh.f32 %v786_v27  ;;  %v1527_v35 = vmul.f32 -1.442695, %v786_v27  ;;  %v1528_v39 = vmul.f32 -1.442695, %v787_v8 }
 0xa0b   :  { %1634 = vtanh.f32 %v787_v8 }
 0xa0c   :  { %1636 = vpow2.f32 %v1527_v35 }
 0xa10   :  { %v1633_v25 = vpop.eup %1632 }
 0xa11   :  { %v1635_v9 = vpop.eup %1634  ;;  %841 = vrot.lane.b32.xlu2 %v1633_v25, %s1857_s23 }
 0xa12   :  { %843 = vrot.lane.b32.xlu0 %v1635_v9, %s1857_s23  ;;  %v1637_v36 = vpop.eup %1636 }
 0xa13   :  { %v794_v37 = vadd.f32 1.0, %v1637_v36 }
 0xa15   :  { %1638 = vrcp.f32 %v794_v37  ;;  %v807_v46 = vand.u32 2147483648, %v794_v37  ;;  %vm801_vm2 = vweird.f32 %v794_v37  ;;  %v805_v47 = vand.u32 2147483647, %v794_v37 }
 0xa16   :  { %1640 = vpow2.f32 %v1528_v39 }
 0xa17   :  { %v808_v49 = vor.u32 1.1754944e-38, %v807_v46  ;;  %vm806_vm4 = vcmp.eq.f32.partialorder %v805_v47, 8.507059e+37 }
 0xa19   :  { %833 = vrot.lane.b32.xlu2 %v830_v31, %s1858_s7 }
 0xa1b   :  { %v1639_v38 = vpop.eup %1638 }
 0xa1c   :  { %v797_v40 = vmul.f32 %v1639_v38, %v794_v37  ;;  %v1641_v43 = vpop.eup %1640  ;;  %vm802_vm0 = vweird.f32 %v1639_v38 }
 0xa1d   :  { %v795_v44 = vadd.f32 1.0, %v1641_v43  ;;  %vm803_vm3 = vmor %vm801_vm2, %vm802_vm0 }
 0xa1e   :  { %v798_v41 = vsub.f32 1.0, %v797_v40 }
 0xa1f   :  { %1642 = vrcp.f32 %v795_v44  ;;  %v822_v58 = vand.u32 2147483648, %v795_v44  ;;  %vm816_vm6 = vweird.f32 %v795_v44  ;;  %v820_v59 = vand.u32 2147483647, %v795_v44 }
 0xa20   :  { %v799_v42 = vmul.f32 %v1639_v38, %v798_v41 }
 0xa21   :  { %v823_v61 = vor.u32 1.1754944e-38, %v822_v58  ;;  %vm821_vm8 = vcmp.eq.f32.partialorder %v820_v59, 8.507059e+37 }
 0xa22   :  { %v800_v45 = vadd.f32 %v1639_v38, %v799_v42 }
 0xa24   :  { %v804_v48 = vsel %vm803_vm3, %v1639_v38, %v800_v45 }
 0xa25   :  { %v809_v51 = vsel %vm806_vm4, %v808_v49, %v804_v48  ;;  %v1643_v53 = vpop.eup %1642 }
 0xa26   :  { %v812_v54 = vmul.f32 %v1643_v53, %v795_v44  ;;  %vm817_vm5 = vweird.f32 %v1643_v53  ;;  %v837_v2 = vmul.f32 %v832_v1, %v809_v51 }
 0xa27   :  { %vm818_vm7 = vmor %vm816_vm6, %vm817_vm5  ;;  %vm1003_vm5 = vcmp.gt.s32.totalorder %v2082_v22, 5 }
 0xa28   :  { %v813_v55 = vsub.f32 1.0, %v812_v54 }
 0xa2a   :  { %v814_v56 = vmul.f32 %v1643_v53, %v813_v55 }
 0xa2c   :  { %v815_v57 = vadd.f32 %v1643_v53, %v814_v56 }
 0xa2e   :  { %v819_v60 = vsel %vm818_vm7, %v1643_v53, %v815_v57 }
 0xa2f   :  { %v824_v62 = vsel %vm821_vm8, %v823_v61, %v819_v60 }
 0xa6b   :  { %v842_v50 = vpop.permute.xlu2 %841 }
 0xa6c   :  { %v847_v52 = vmul.f32 %v842_v50, %v809_v51 }
 0xa6e   :  { %851 = vrot.lane.b32.xlu0 %v847_v52, %s1858_s7 }
 0xa73   :  { %v834_v10 = vpop.permute.xlu2 %833 }
 0xa74   :  { %v838_v11 = vmul.f32 %v834_v10, %v824_v62 }
 0xa84   :  { %v844_v63 = vpop.permute.xlu0 %843 }
 0xa85   :  { %v848_v0 = vmul.f32 %v844_v63, %v824_v62 }
 0xa87   :  { %853 = vrot.lane.b32.xlu1 %v848_v0, %s1858_s7 }
 0xae0   :  { %v852_v3 = vpop.permute.xlu0 %851 }
 0xae1   :  { %v857_v4 = vadd.f32 %v852_v3, %v837_v2 }
 0xae3   :  { %1644 = vtanh.f32 %v857_v4  ;;  %v883_v14 = vrot.slane %v857_v4, 4 }
 0xae9   :  { %v1645_v5 = vpop.eup %1644 }
 0xaea   :  { %863 = vrot.lane.b32.xlu2 %v1645_v5, %s1857_s23 }
 0xaf9   :  { %v854_v12 = vpop.permute.xlu1 %853 }
 0xafa   :  { %v858_v13 = vadd.f32 %v854_v12, %v838_v11 }
 0xafc   :  { %1646 = vtanh.f32 %v858_v13  ;;  %v884_v16 = vrot.slane %v858_v13, 3 }
 0xafe   :  { %v885_v17 = vsel %vm352_vm11, %v884_v16, %v883_v14 }
 0xaff   :  { %886 = vrot.lane.b32.xlu2 %v885_v17, %s1861_s28 }
 0xb02   :  { %v1647_v18 = vpop.eup %1646 }
 0xb03   :  { %865 = vrot.lane.b32.xlu0 %v1647_v18, %s1857_s23 }
 0xb44   :  { %v864_v19 = vpop.permute.xlu2 %863 }
 0xb45   :  { %v869_v29 = vmul.f32 %v864_v19, %v809_v51 }
 0xb47   :  { %v874_v34 = vrot.slane %v869_v29, 4 }
 0xb59   :  { %v887_v21 = vpop.permute.xlu2 %886 }
 0xb5a   :  { %v2186_v23 = vsel %vm871_vm9, %v887_v21, %v2163_v32 }
 0xb5b   :  { %v961_v26 = vrot.slane %v2186_v23, 3 }
 0xb5d   :  { %963 = vrot.lane.b32.xlu2 %v961_v26, %s1858_s7 }
 0xb75   :  { %v866_v30 = vpop.permute.xlu0 %865 }
 0xb76   :  { %v870_v33 = vmul.f32 %v866_v30, %v824_v62 }
 0xb78   :  { %v875_v6 = vrot.slane %v870_v33, 3 }
 0xb7a   :  { %v876_v15 = vsel %vm352_vm11, %v875_v6, %v874_v34 }
 0xb7b   :  { %877 = vrot.lane.b32.xlu1 %v876_v15, %s1858_s7 }
 0xbb7   :  { %v964_v3 = vpop.permute.xlu2 %963 }
 0xbed   :  { %v878_v7 = vpop.permute.xlu1 %877 }
 0xbee   :  { %v2193_v27 = vsel %vm871_vm9, %v878_v7, %v2168_v28  ;;  %v962_v28 = vrot.slane %v2186_v23, 4 }
 0xbef   :  { %1529 = vmatmul.msk.f32.vlgmr.msra.gmra.mxu1 %vm244_vm14, %v2193_v27 }
 0xc6c   :  { %v910_v32 = vpop.f32.mrf.mxu1 }
 0xc6d   :  { %v914_v8 = vrot.slane %v910_v32, 3  ;;  %v915_v25 = vrot.slane %v910_v32, 4 }
 0xc6f   :  { %v918_v9 = vadd.f32 %v914_v8, %v2066_v24  ;;  %v919_v31 = vadd.f32 %v915_v25, %v2063_v20 }
 0xc71   :  { %1648 = vtanh.f32 %v918_v9  ;;  %v1530_v37 = vmul.f32 -1.442695, %v918_v9  ;;  %v1531_v38 = vmul.f32 -1.442695, %v919_v31 }
 0xc72   :  { %1650 = vtanh.f32 %v919_v31 }
 0xc73   :  { %1652 = vpow2.f32 %v1530_v37 }
 0xc74   :  { %1654 = vpow2.f32 %v1531_v38 }
 0xc77   :  { %v1649_v35 = vpop.eup %1648 }
 0xc78   :  { %v1651_v36 = vpop.eup %1650  ;;  %973 = vrot.lane.b32.xlu0 %v1649_v35, %s1857_s23 }
 0xc79   :  { %975 = vrot.lane.b32.xlu1 %v1651_v36, %s1857_s23  ;;  %v1653_v39 = vpop.eup %1652 }
 0xc7a   :  { %v1655_v40 = vpop.eup %1654  ;;  %v926_v41 = vadd.f32 1.0, %v1653_v39 }
 0xc7b   :  { %v927_v42 = vadd.f32 1.0, %v1655_v40 }
 0xc7c   :  { %1656 = vrcp.f32 %v926_v41  ;;  %v939_v53 = vand.u32 2147483648, %v926_v41  ;;  %vm933_vm13 = vweird.f32 %v926_v41  ;;  %v937_v55 = vand.u32 2147483647, %v926_v41 }
 0xc7d   :  { %1658 = vrcp.f32 %v927_v42  ;;  %v954_v54 = vand.u32 2147483648, %v927_v42  ;;  %vm948_vm15 = vweird.f32 %v927_v42  ;;  %v952_v56 = vand.u32 2147483647, %v927_v42 }
 0xc7e   :  { %v940_v59 = vor.u32 1.1754944e-38, %v939_v53  ;;  %vm938_vm3 = vcmp.eq.f32.partialorder %v937_v55, 8.507059e+37 }
 0xc7f   :  { %v955_v60 = vor.u32 1.1754944e-38, %v954_v54  ;;  %vm953_vm4 = vcmp.eq.f32.partialorder %v952_v56, 8.507059e+37 }
 0xc80   :  { %965 = vrot.lane.b32.xlu0 %v962_v28, %s1858_s7 }
 0xc82   :  { %v1657_v43 = vpop.eup %1656 }
 0xc83   :  { %v1659_v44 = vpop.eup %1658  ;;  %v929_v45 = vmul.f32 %v1657_v43, %v926_v41  ;;  %vm934_vm10 = vweird.f32 %v1657_v43 }
 0xc84   :  { %v944_v46 = vmul.f32 %v1659_v44, %v927_v42  ;;  %vm949_vm12 = vweird.f32 %v1659_v44  ;;  %vm935_vm0 = vmor %vm933_vm13, %vm934_vm10 }
 0xc85   :  { %v930_v47 = vsub.f32 1.0, %v929_v45  ;;  %vm950_vm2 = vmor %vm948_vm15, %vm949_vm12 }
 0xc86   :  { %v945_v48 = vsub.f32 1.0, %v944_v46 }
 0xc87   :  { %v931_v49 = vmul.f32 %v1657_v43, %v930_v47 }
 0xc88   :  { %v946_v50 = vmul.f32 %v1659_v44, %v945_v48 }
 0xc89   :  { %v932_v51 = vadd.f32 %v1657_v43, %v931_v49 }
 0xc8a   :  { %v947_v52 = vadd.f32 %v1659_v44, %v946_v50 }
 0xc8b   :  { %v936_v57 = vsel %vm935_vm0, %v1657_v43, %v932_v51  ;;  %vm1135_vm0 = vcmp.gt.s32.totalorder %v2082_v22, 6 }
 0xc8c   :  { %v951_v58 = vsel %vm950_vm2, %v1659_v44, %v947_v52  ;;  %v941_v62 = vsel %vm938_vm3, %v940_v59, %v936_v57 }
 0xc8d   :  { %v956_v0 = vsel %vm953_vm4, %v955_v60, %v951_v58  ;;  %v969_v13 = vmul.f32 %v964_v3, %v941_v62 }
 0xcea   :  { %v974_v61 = vpop.permute.xlu0 %973 }
 0xceb   :  { %v976_v63 = vpop.permute.xlu1 %975  ;;  %v979_v1 = vmul.f32 %v974_v61, %v941_v62 }
 0xcec   :  { %v980_v2 = vmul.f32 %v976_v63, %v956_v0 }
 0xced   :  { %983 = vrot.lane.b32.xlu1 %v979_v1, %s1858_s7 }
 0xcee   :  { %985 = vrot.lane.b32.xlu2 %v980_v2, %s1858_s7 }
 0xcf2   :  { %v966_v4 = vpop.permute.xlu0 %965 }
 0xcf3   :  { %v970_v5 = vmul.f32 %v966_v4, %v956_v0 }
 0xd48   :  { %v986_v10 = vpop.permute.xlu2 %985 }
 0xd49   :  { %v990_v11 = vadd.f32 %v986_v10, %v970_v5 }
 0xd4b   :  { %1660 = vtanh.f32 %v990_v11  ;;  %v1016_v19 = vrot.slane %v990_v11, 4 }
 0xd51   :  { %v1661_v12 = vpop.eup %1660 }
 0xd52   :  { %997 = vrot.lane.b32.xlu1 %v1661_v12, %s1857_s23 }
 0xd5f   :  { %v984_v14 = vpop.permute.xlu1 %983 }
 0xd60   :  { %v989_v16 = vadd.f32 %v984_v14, %v969_v13 }
 0xd62   :  { %1662 = vtanh.f32 %v989_v16  ;;  %v1015_v18 = vrot.slane %v989_v16, 5 }
 0xd64   :  { %v1017_v21 = vsel %vm352_vm11, %v1016_v19, %v1015_v18 }
 0xd68   :  { %v1663_v17 = vpop.eup %1662 }
 0xd69   :  { %995 = vrot.lane.b32.xlu0 %v1663_v17, %s1857_s23 }
 0xd71   :  { %1018 = vrot.lane.b32.xlu0 %v1017_v21, %s1861_s28 }
 0xdc4   :  { %v998_v26 = vpop.permute.xlu1 %997 }
 0xdc5   :  { %v1002_v29 = vmul.f32 %v998_v26, %v956_v0 }
 0xdc7   :  { %v1007_v34 = vrot.slane %v1002_v29, 4 }
 0xddb   :  { %v996_v30 = vpop.permute.xlu0 %995 }
 0xddc   :  { %v1001_v33 = vmul.f32 %v996_v30, %v941_v62 }
 0xdde   :  { %v1006_v6 = vrot.slane %v1001_v33, 5 }
 0xde0   :  { %v1008_v15 = vsel %vm352_vm11, %v1007_v34, %v1006_v6 }
 0xde1   :  { %1009 = vrot.lane.b32.xlu2 %v1008_v15, %s1858_s7 }
 0xde3   :  { %v1019_v7 = vpop.permute.xlu0 %1018 }
 0xde4   :  { %v2213_v32 = vsel %vm1003_vm5, %v1019_v7, %v2186_v23 }
 0xde5   :  { %v1093_v8 = vrot.slane %v2213_v32, 2 }
 0xde7   :  { %1095 = vrot.lane.b32.xlu0 %v1093_v8, %s1858_s7 }
 0xe3b   :  { %v1010_v25 = vpop.permute.xlu2 %1009 }
 0xe3c   :  { %v2218_v9 = vsel %vm1003_vm5, %v1010_v25, %v2193_v27  ;;  %v1094_v27 = vrot.slane %v2213_v32, 3 }
 0xe3d   :  { %1532 = vmatmul.msk.f32.vlgmr.msrb.gmra.mxu2 %vm244_vm14, %v2218_v9 }
 0xe59   :  { %v1096_v5 = vpop.permute.xlu0 %1095 }
 0xec0   :  { %v1042_v31 = vpop.f32.mrf.mxu2 }
 0xec1   :  { %v1046_v35 = vrot.slane %v1042_v31, 2  ;;  %v1047_v36 = vrot.slane %v1042_v31, 3 }
 0xec3   :  { %v1050_v28 = vadd.f32 %v1046_v35, %v2066_v24  ;;  %v1051_v37 = vadd.f32 %v1047_v36, %v2063_v20 }
 0xec5   :  { %1664 = vtanh.f32 %v1050_v28  ;;  %v1534_v39 = vmul.f32 -1.442695, %v1051_v37  ;;  %v1533_v43 = vmul.f32 -1.442695, %v1050_v28 }
 0xec6   :  { %1666 = vtanh.f32 %v1051_v37 }
 0xec7   :  { %1668 = vpow2.f32 %v1534_v39 }
 0xecb   :  { %v1665_v23 = vpop.eup %1664 }
 0xecc   :  { %v1667_v38 = vpop.eup %1666  ;;  %1105 = vrot.lane.b32.xlu1 %v1665_v23, %s1857_s23 }
 0xecd   :  { %1107 = vrot.lane.b32.xlu2 %v1667_v38, %s1857_s23  ;;  %v1669_v40 = vpop.eup %1668 }
 0xece   :  { %v1059_v41 = vadd.f32 1.0, %v1669_v40 }
 0xed0   :  { %1670 = vrcp.f32 %v1059_v41  ;;  %v1086_v50 = vand.u32 2147483648, %v1059_v41  ;;  %vm1080_vm7 = vweird.f32 %v1059_v41  ;;  %v1084_v51 = vand.u32 2147483647, %v1059_v41 }
 0xed1   :  { %1672 = vpow2.f32 %v1533_v43 }
 0xed2   :  { %v1087_v53 = vor.u32 1.1754944e-38, %v1086_v50  ;;  %vm1085_vm9 = vcmp.eq.f32.partialorder %v1084_v51, 8.507059e+37 }
 0xed4   :  { %1097 = vrot.lane.b32.xlu1 %v1094_v27, %s1858_s7 }
 0xed6   :  { %v1671_v42 = vpop.eup %1670 }
 0xed7   :  { %v1076_v44 = vmul.f32 %v1671_v42, %v1059_v41  ;;  %v1673_v46 = vpop.eup %1672  ;;  %vm1081_vm6 = vweird.f32 %v1671_v42 }
 0xed8   :  { %v1058_v48 = vadd.f32 1.0, %v1673_v46  ;;  %vm1082_vm8 = vmor %vm1080_vm7, %vm1081_vm6 }
 0xed9   :  { %v1077_v45 = vsub.f32 1.0, %v1076_v44 }
 0xeda   :  { %1674 = vrcp.f32 %v1058_v48  ;;  %v1071_v62 = vand.u32 2147483648, %v1058_v48  ;;  %vm1065_vm12 = vweird.f32 %v1058_v48  ;;  %v1069_v63 = vand.u32 2147483647, %v1058_v48 }
 0xedb   :  { %v1078_v47 = vmul.f32 %v1671_v42, %v1077_v45 }
 0xedc   :  { %v1072_v1 = vor.u32 1.1754944e-38, %v1071_v62  ;;  %vm1070_vm15 = vcmp.eq.f32.partialorder %v1069_v63, 8.507059e+37 }
 0xedd   :  { %v1079_v49 = vadd.f32 %v1671_v42, %v1078_v47 }
 0xedf   :  { %v1083_v52 = vsel %vm1082_vm8, %v1671_v42, %v1079_v49 }
 0xee0   :  { %v1088_v55 = vsel %vm1085_vm9, %v1087_v53, %v1083_v52  ;;  %v1675_v56 = vpop.eup %1674 }
 0xee1   :  { %v1061_v58 = vmul.f32 %v1675_v56, %v1058_v48  ;;  %vm1066_vm10 = vweird.f32 %v1675_v56 }
 0xee2   :  { %vm1067_vm13 = vmor %vm1065_vm12, %vm1066_vm10  ;;  %vm1267_vm10 = vcmp.gt.s32.totalorder %v2082_v22, 7 }
 0xee3   :  { %v1062_v59 = vsub.f32 1.0, %v1061_v58 }
 0xee5   :  { %v1063_v60 = vmul.f32 %v1675_v56, %v1062_v59 }
 0xee7   :  { %v1064_v61 = vadd.f32 %v1675_v56, %v1063_v60 }
 0xee9   :  { %v1068_v0 = vsel %vm1067_vm13, %v1675_v56, %v1064_v61 }
 0xeea   :  { %v1073_v3 = vsel %vm1070_vm15, %v1072_v1, %v1068_v0 }
 0xeeb   :  { %v1101_v11 = vmul.f32 %v1096_v5, %v1073_v3 }
 0xf27   :  { %v1108_v54 = vpop.permute.xlu2 %1107 }
 0xf28   :  { %v1112_v57 = vmul.f32 %v1108_v54, %v1088_v55 }
 0xf2a   :  { %1117 = vrot.lane.b32.xlu0 %v1112_v57, %s1858_s7 }
 0xf3e   :  { %v1106_v2 = vpop.permute.xlu1 %1105 }
 0xf3f   :  { %v1111_v4 = vmul.f32 %v1106_v2, %v1073_v3 }
 0xf41   :  { %1115 = vrot.lane.b32.xlu2 %v1111_v4, %s1858_s7 }
 0xf46   :  { %v1098_v10 = vpop.permute.xlu1 %1097 }
 0xf47   :  { %v1102_v12 = vmul.f32 %v1098_v10, %v1088_v55 }
 0xf9b   :  { %v1116_v13 = vpop.permute.xlu2 %1115 }
 0xf9c   :  { %v1121_v14 = vadd.f32 %v1116_v13, %v1101_v11  ;;  %v1118_v16 = vpop.permute.xlu0 %1117 }
 0xf9d   :  { %v1122_v17 = vadd.f32 %v1118_v16, %v1102_v12 }
 0xf9e   :  { %1676 = vtanh.f32 %v1121_v14  ;;  %v1147_v21 = vrot.slane %v1121_v14, 6 }
 0xf9f   :  { %1678 = vtanh.f32 %v1122_v17  ;;  %v1148_v26 = vrot.slane %v1122_v17, 5 }
 0xfa1   :  { %v1149_v29 = vsel %vm352_vm11, %v1148_v26, %v1147_v21  ;;  %v1280_v21 = vld [vmem:[#allocation6 + $0x18] sm:$0xff]  ;;  %v1279_v26 = vld [vmem:[#allocation6 + $0x10] sm:$0xff] }
 0xfa2   :  { %1300 = vmatpush.msrb.mxu0 %v1280_v21  ;;  %v1436_v21 = vld [vmem:[#allocation10 + $0x8] sm:$0xff] }
 0xfa4   :  { %v1677_v18 = vpop.eup %1676  ;;  %1301 = vmatpush.msrb.mxu0 %v1279_v26  ;;  %v1435_v26 = vld [vmem:[#allocation10] sm:$0xff] }
 0xfa5   :  { %v1679_v19 = vpop.eup %1678  ;;  %1127 = vrot.lane.b32.xlu1 %v1677_v18, %s1857_s23 }
 0xfa6   :  { %1129 = vrot.lane.b32.xlu2 %v1679_v19, %s1857_s23 }
 0xfad   :  { %1150 = vrot.lane.b32.xlu1 %v1149_v29, %s1861_s28  ;;  %v1278_v29 = vld [vmem:[#allocation6 + $0x8] sm:$0xff] }
 0xfae   :  { %1302 = vmatpush.msrb.mxu0 %v1278_v29  ;;  %v1566_v29 = vld [vmem:[%s2301_s13] ss:$0 sm:$0xff]  ;;  %s1865_s13 = smov 127  }
0x1000   :  { %v1130_v30 = vpop.permute.xlu2 %1129 }
0x1001   :  { %v1134_v33 = vmul.f32 %v1130_v30, %v1088_v55  ;;  %v1277_v30 = vld [vmem:[#allocation6] sm:$0xff] }
0x1002   :  { %1303 = vmatpush.msrb.mxu0 %v1277_v30 }
0x1003   :  { %v1139_v15 = vrot.slane %v1134_v33, 5 }
0x1017   :  { %v1128_v34 = vpop.permute.xlu1 %1127 }
0x1018   :  { %v1133_v6 = vmul.f32 %v1128_v34, %v1073_v3 }
0x101a   :  { %v1138_v7 = vrot.slane %v1133_v6, 6 }
0x101c   :  { %v1140_v8 = vsel %vm352_vm11, %v1139_v15, %v1138_v7 }
0x101d   :  { %1141 = vrot.lane.b32.xlu0 %v1140_v8, %s1858_s7 }
0x101f   :  { %v1151_v25 = vpop.permute.xlu1 %1150 }
0x1020   :  { %v1153_v31 = vsel %vm1135_vm0, %v1151_v25, %v2213_v32 }
0x1021   :  { %v1225_v35 = vrot.slane %v1153_v31, 1 }
0x1023   :  { %1227 = vrot.lane.b32.xlu1 %v1225_v35, %s1858_s7  ;;  %v1311_v35 = vld [vmem:[#allocation7 + $0x10] sm:$0xff] }
0x108f   :  { %v1142_v36 = vpop.permute.xlu0 %1141 }
0x1090   :  { %v2240_v28 = vsel %vm1135_vm0, %v1142_v36, %v2218_v9  ;;  %v1226_v9 = vrot.slane %v1153_v31, 2  ;;  %v1312_v31 = vld [vmem:[#allocation7 + $0x18] sm:$0xff]  ;;  %v1310_v36 = vld [vmem:[#allocation7 + $0x8] sm:$0xff] }
0x1091   :  { %1535 = vmatmul.msk.f32.vlgmr.msrb.gmra.mxu3 %vm244_vm14, %v2240_v28  ;;  %1355 = vmatpush.msra.mxu2 %v1312_v31 }
0x1093   :  { %1356 = vmatpush.msra.mxu2 %v1311_v35 }
0x1095   :  { %v1228_v5 = vpop.permute.xlu1 %1227  ;;  %1357 = vmatpush.msra.mxu2 %v1310_v36 }
0x1114   :  { %v1174_v37 = vpop.f32.mrf.mxu3 }
0x1115   :  { %v1178_v23 = vrot.slane %v1174_v37, 1  ;;  %v1179_v38 = vrot.slane %v1174_v37, 2  ;;  %v1309_v37 = vld [vmem:[#allocation7] sm:$0xff] }
0x1116   :  { %1358 = vmatpush.msra.mxu2 %v1309_v37 }
0x1117   :  { %v1182_v27 = vadd.f32 %v1178_v23, %v2066_v24  ;;  %v1183_v39 = vadd.f32 %v1179_v38, %v2063_v20  ;;  %v1308_v23 = vld [vmem:[%s2317_s6] sm:$0x3] }
0x1118   :  { %1540 = vmatmul.msk.f32.vlgmr.msra.gmra.mxu2 %vm244_vm14, %v1308_v23 }
0x1119   :  { %1680 = vtanh.f32 %v1182_v27  ;;  %v1536_v41 = vmul.f32 -1.442695, %v1182_v27  ;;  %v1537_v24 = vmul.f32 -1.442695, %v1183_v39 }
0x111a   :  { %1682 = vtanh.f32 %v1183_v39  ;;  %v1314_v39 = vld [vmem:[#allocation7 + $0x28] sm:$0xff] }
0x111b   :  { %1684 = vpow2.f32 %v1536_v41  ;;  %1334 = vmatpush.msrb.mxu1 %v1314_v39  ;;  %v1564_v41 = vld [vmem:[%s2297_s9] ss:$0 sm:$0xff] }
0x111f   :  { %v1681_v32 = vpop.eup %1680 }
0x1120   :  { %v1683_v40 = vpop.eup %1682  ;;  %1237 = vrot.lane.b32.xlu2 %v1681_v32, %s1857_s23  ;;  %v1313_v32 = vld [vmem:[#allocation7 + $0x20] sm:$0xff] }
0x1121   :  { %1239 = vrot.lane.b32.xlu0 %v1683_v40, %s1857_s23  ;;  %v1685_v42 = vpop.eup %1684  ;;  %1335 = vmatpush.msrb.mxu1 %v1313_v32  ;;  %v1316_v40 = vld [vmem:[#allocation7 + $0x38] sm:$0xff] }
0x1122   :  { %v1190_v43 = vadd.f32 1.0, %v1685_v42  ;;  %1381 = vmatpush.msra.mxu3 %v1316_v40 }
0x1124   :  { %1686 = vrcp.f32 %v1190_v43  ;;  %v1203_v50 = vand.u32 2147483648, %v1190_v43  ;;  %vm1197_vm3 = vweird.f32 %v1190_v43  ;;  %v1201_v51 = vand.u32 2147483647, %v1190_v43 }
0x1125   :  { %1688 = vpow2.f32 %v1537_v24  ;;  %v1407_v24 = vld [vmem:[#allocation9 + $0x68] sm:$0xff] }
0x1126   :  { %v1204_v53 = vor.u32 1.1754944e-38, %v1203_v50  ;;  %vm1202_vm5 = vcmp.eq.f32.partialorder %v1201_v51, 8.507059e+37  ;;  %v1400_v50 = vld [vmem:[#allocation9 + $0x30] sm:$0xff]  ;;  %v1399_v51 = vld [vmem:[#allocation9 + $0x28] sm:$0xff] }
0x1128   :  { %1229 = vrot.lane.b32.xlu2 %v1226_v9, %s1858_s7  ;;  %v1315_v9 = vld [vmem:[#allocation7 + $0x30] sm:$0xff] }
0x1129   :  { %1382 = vmatpush.msra.mxu3 %v1315_v9 }
0x112a   :  { %v1687_v44 = vpop.eup %1686 }
0x112b   :  { %v1193_v45 = vmul.f32 %v1687_v44, %v1190_v43  ;;  %v1689_v47 = vpop.eup %1688  ;;  %vm1198_vm2 = vweird.f32 %v1687_v44 }
0x112c   :  { %v1191_v48 = vadd.f32 1.0, %v1689_v47  ;;  %vm1199_vm4 = vmor %vm1197_vm3, %vm1198_vm2  ;;  %v1403_v47 = vld [vmem:[#allocation9 + $0x48] sm:$0xff] }
0x112d   :  { %v1194_v20 = vsub.f32 1.0, %v1193_v45  ;;  %v1406_v45 = vld [vmem:[#allocation9 + $0x60] sm:$0xff] }
0x112e   :  { %1690 = vrcp.f32 %v1191_v48  ;;  %v1218_v62 = vand.u32 2147483648, %v1191_v48  ;;  %vm1212_vm7 = vweird.f32 %v1191_v48  ;;  %v1216_v63 = vand.u32 2147483647, %v1191_v48 }
0x112f   :  { %v1195_v46 = vmul.f32 %v1687_v44, %v1194_v20  ;;  %v1405_v20 = vld [vmem:[#allocation9 + $0x58] sm:$0xff] }
0x1130   :  { %v1219_v1 = vor.u32 1.1754944e-38, %v1218_v62  ;;  %vm1217_vm9 = vcmp.eq.f32.partialorder %v1216_v63, 8.507059e+37  ;;  %v1445_v62 = vld [vmem:[#allocation10 + $0x50] sm:$0xff]  ;;  %v1444_v63 = vld [vmem:[#allocation10 + $0x48] sm:$0xff] }
0x1131   :  { %v1196_v49 = vadd.f32 %v1687_v44, %v1195_v46  ;;  %v1404_v46 = vld [vmem:[#allocation9 + $0x50] sm:$0xff] }
0x1133   :  { %v1200_v52 = vsel %vm1199_vm4, %v1687_v44, %v1196_v49  ;;  %v1408_v44 = vld [vmem:[#allocation9 + $0x70] sm:$0xff]  ;;  %v1401_v49 = vld [vmem:[#allocation9 + $0x38] sm:$0xff] }
0x1134   :  { %v1205_v55 = vsel %vm1202_vm5, %v1204_v53, %v1200_v52  ;;  %v1691_v57 = vpop.eup %1690  ;;  %v1398_v52 = vld [vmem:[#allocation9 + $0x20] sm:$0xff]  ;;  %v1397_v53 = vld [vmem:[#allocation9 + $0x18] sm:$0xff] }
0x1135   :  { %v1208_v58 = vmul.f32 %v1691_v57, %v1191_v48  ;;  %vm1213_vm6 = vweird.f32 %v1691_v57  ;;  %v1233_v10 = vmul.f32 %v1228_v5, %v1205_v55  ;;  %v1402_v48 = vld [vmem:[#allocation9 + $0x40] sm:$0xff] }
0x1136   :  { %vm1214_vm8 = vmor %vm1212_vm7, %vm1213_vm6 }
0x1137   :  { %v1209_v59 = vsub.f32 1.0, %v1208_v58  ;;  %v1449_v58 = vld [vmem:[#allocation10 + $0x70] sm:$0xff] }
0x1139   :  { %v1210_v60 = vmul.f32 %v1691_v57, %v1209_v59  ;;  %v1448_v59 = vld [vmem:[#allocation10 + $0x68] sm:$0xff] }
0x113b   :  { %v1211_v61 = vadd.f32 %v1691_v57, %v1210_v60  ;;  %v1447_v60 = vld [vmem:[#allocation10 + $0x60] sm:$0xff] }
0x113d   :  { %v1215_v0 = vsel %vm1214_vm8, %v1691_v57, %v1211_v61  ;;  %v1450_v57 = vld [vmem:[#allocation10 + $0x78] sm:$0xff] }
0x113e   :  { %v1220_v2 = vsel %vm1217_vm9, %v1219_v1, %v1215_v0  ;;  %1455 = vmatpush.msra.mxu1 %v1450_v57  ;;  %v1446_v61 = vld [vmem:[#allocation10 + $0x58] sm:$0xff]  ;;  %v1443_v0 = vld [vmem:[#allocation10 + $0x40] sm:$0xff] }
0x113f   :  { %v1442_v1 = vld [vmem:[#allocation10 + $0x38] sm:$0xff] }
0x1140   :  { %1456 = vmatpush.msra.mxu1 %v1449_v58 }
0x1142   :  { %1457 = vmatpush.msra.mxu1 %v1448_v59 }
0x1144   :  { %1458 = vmatpush.msra.mxu1 %v1447_v60 }
0x1146   :  { %1459 = vmatpush.msra.mxu1 %v1446_v61 }
0x1148   :  { %1460 = vmatpush.msra.mxu1 %v1445_v62 }
0x114a   :  { %1461 = vmatpush.msra.mxu1 %v1444_v63 }
0x114c   :  { %1462 = vmatpush.msra.mxu1 %v1443_v0 }
0x114e   :  { %1463 = vmatpush.msra.mxu1 %v1442_v1 }
0x117a   :  { %v1238_v54 = vpop.permute.xlu2 %1237 }
0x117b   :  { %v1243_v56 = vmul.f32 %v1238_v54, %v1205_v55  ;;  %v1396_v54 = vld [vmem:[#allocation9 + $0x10] sm:$0xff] }
0x117d   :  { %1247 = vrot.lane.b32.xlu0 %v1243_v56, %s1858_s7  ;;  %v1394_v56 = vld [vmem:[#allocation9] sm:$0xff] }
0x1182   :  { %v1230_v14 = vpop.permute.xlu2 %1229 }
0x1183   :  { %v1234_v16 = vmul.f32 %v1230_v14, %v1220_v2 }
0x1193   :  { %v1240_v3 = vpop.permute.xlu0 %1239 }
0x1194   :  { %v1244_v4 = vmul.f32 %v1240_v3, %v1220_v2  ;;  %v1440_v3 = vld [vmem:[#allocation10 + $0x28] sm:$0xff] }
0x1196   :  { %1249 = vrot.lane.b32.xlu1 %v1244_v4, %s1858_s7  ;;  %v1439_v4 = vld [vmem:[#allocation10 + $0x20] sm:$0xff] }
0x11ef   :  { %v1248_v11 = vpop.permute.xlu0 %1247 }
0x11f0   :  { %v1253_v12 = vadd.f32 %v1248_v11, %v1233_v10  ;;  %v1360_v10 = vpop.f32.mrf.mxu2  ;;  %v1438_v11 = vld [vmem:[#allocation10 + $0x18] sm:$0xff] }
0x11f2   :  { %1692 = vtanh.f32 %v1253_v12 }
0x11f8   :  { %v1693_v13 = vpop.eup %1692 }
0x11f9   :  { %1259 = vrot.lane.b32.xlu2 %v1693_v13, %s1857_s23  ;;  %v1565_v13 = vld [vmem:[%s2299_s11] ss:$0 sm:$0xff] }
0x1208   :  { %v1250_v17 = vpop.permute.xlu1 %1249 }
0x1209   :  { %v1254_v18 = vadd.f32 %v1250_v17, %v1234_v16 }
0x120b   :  { %1694 = vtanh.f32 %v1254_v18 }
0x1211   :  { %v1695_v19 = vpop.eup %1694 }
0x1212   :  { %1261 = vrot.lane.b32.xlu0 %v1695_v19, %s1857_s23  ;;  %v1437_v19 = vld [vmem:[#allocation10 + $0x10] sm:$0xff] }
0x1253   :  { %v1260_v33 = vpop.permute.xlu2 %1259 }
0x1254   :  { %v1265_v34 = vmul.f32 %v1260_v33, %v1205_v55  ;;  %v1395_v55 = vld [vmem:[#allocation9 + $0x8] sm:$0xff] }
0x1256   :  { %v1270_v7 = vrot.slane %v1265_v34, 7 }
0x1284   :  { %v1262_v6 = vpop.permute.xlu0 %1261 }
0x1285   :  { %v1266_v15 = vmul.f32 %v1262_v6, %v1220_v2  ;;  %v1441_v2 = vld [vmem:[#allocation10 + $0x30] sm:$0xff] }
0x1286   :  { %1464 = vmatpush.msra.mxu1 %v1441_v2  ;;  %v1567_v6 = vld [vmem:[%s2303_s15] ss:$0 sm:$0xff] }
0x1287   :  { %v1271_v8 = vrot.slane %v1266_v15, 6 }
0x1288   :  { %1465 = vmatpush.msra.mxu1 %v1440_v3 }
0x1289   :  { %v1272_v25 = vsel %vm352_vm11, %v1271_v8, %v1270_v7 }
0x128a   :  { %1273 = vrot.lane.b32.xlu1 %v1272_v25, %s1858_s7  ;;  %1466 = vmatpush.msra.mxu1 %v1439_v4 }
0x128c   :  { %1467 = vmatpush.msra.mxu1 %v1438_v11 }
0x128e   :  { %1468 = vmatpush.msra.mxu1 %v1437_v19 }
0x1290   :  { %1469 = vmatpush.msra.mxu1 %v1436_v21 }
0x1292   :  { %1470 = vmatpush.msra.mxu1 %v1435_v26 }
0x12fc   :  { %v1274_v38 = vpop.permute.xlu1 %1273 }
0x12fd   :  { %v1276_v27 = vsel %vm1267_vm10, %v1274_v38, %v2240_v28  ;;  %v1409_v28 = vld [vmem:[#allocation9 + $0x78] sm:$0xff] }
0x12fe   :  { %1538 = vmatmul.msk.f32.vlgmr.msrb.gmra.mxu0 %vm244_vm14, %v1276_v27 }
0x12ff   :  { %1414 = vmatpush.msra.mxu0 %v1409_v28 }
0x1301   :  { %1415 = vmatpush.msra.mxu0 %v1408_v44 }
0x1303   :  { %1416 = vmatpush.msra.mxu0 %v1407_v24 }
0x1305   :  { %1417 = vmatpush.msra.mxu0 %v1406_v45 }
0x1307   :  { %1418 = vmatpush.msra.mxu0 %v1405_v20 }
0x1309   :  { %1419 = vmatpush.msra.mxu0 %v1404_v46 }
0x130b   :  { %1420 = vmatpush.msra.mxu0 %v1403_v47 }
0x130d   :  { %1421 = vmatpush.msra.mxu0 %v1402_v48 }
0x130f   :  { %1422 = vmatpush.msra.mxu0 %v1401_v49 }
0x1311   :  { %1423 = vmatpush.msra.mxu0 %v1400_v50 }
0x1313   :  { %1424 = vmatpush.msra.mxu0 %v1399_v51 }
0x1315   :  { %1425 = vmatpush.msra.mxu0 %v1398_v52 }
0x1317   :  { %1426 = vmatpush.msra.mxu0 %v1397_v53 }
0x1319   :  { %1427 = vmatpush.msra.mxu0 %v1396_v54 }
0x131b   :  { %1428 = vmatpush.msra.mxu0 %v1395_v55 }
0x131d   :  { %1429 = vmatpush.msra.mxu0 %v1394_v56 }
0x137b   :  { %v1305_v42 = vpop.f32.mrf.mxu0 }
0x137c   :  { %v1306_v43 = vadd.f32 %v1564_v41, %v1305_v42 }
0x137e   :  { %1363 = vrot.lane.b32.xlu2 %v1306_v43, %s1862_s24  ;;  %1539 = vmatmul.msk.f32.vlgmr.msrb.gmra.mxu1 %vm159_vm1, %v1306_v43 }
0x13d8   :  { %v1364_v22 = vpop.permute.xlu2 %1363 }
0x13d9   :  { %1541 = vmatmul.msk.f32.vlgmr.msra.gmra.mxu3 %vm159_vm1, %v1364_v22  ;;  %vm1475_vm1 = vcmask 1024  }
0x13fb   :  { %v1337_v5 = vpop.f32.mrf.mxu1 }
0x13fc   :  { %v1361_v12 = vadd.f32 %v1360_v10, %v1337_v5 }
0x145c   :  { %v1384_v14 = vpop.f32.mrf.mxu3 }
0x145d   :  { %v1387_v16 = vadd.f32 %v1384_v14, %v1361_v12 }
0x145f   :  { %v1392_v17 = vadd.f32 %v1565_v13, %v1387_v16 }
0x1461   :  { %v1393_v18 = vmax.f32 %v1392_v17, 0.0 }
0x1463   :  { %1430 = vmatmul.f32.vlgmr.msra.gmra.mxu0 %v1393_v18 }
0x14e0   :  { %v1431_v30 = vpop.f32.mrf.mxu0 }
0x14e1   :  { %v1432_v33 = vadd.f32 %v1566_v29, %v1431_v30 }
0x14e3   :  { %v1434_v34 = vmax.f32 %v1432_v33, 0.0 }
0x14e5   :  { %1471 = vmatmul.f32.vlgmr.msra.gmra.mxu1 %v1434_v34 }
0x1562   :  { %v1472_v15 = vpop.f32.mrf.mxu1 }
0x1563   :  { %v1473_v7 = vadd.f32 %v1567_v6, %v1472_v15 }
0x1565   :  { %1486 = vrot.lane.b32.xlu2 %v1473_v7, %s1863_s20  ;;  %1482 = vrot.lane.b32.xlu1 %v1473_v7, %s1864_s4  ;;  %1476 = vst.msk [vmem:[%s2304_s16] sm:$0x3] %vm1475_vm1, %v1473_v7 }
0x1566   :  { %1478 = vrot.lane.b32.xlu0 %v1473_v7, %s1865_s13 }
0x15bf   :  { %v1487_v8 = vpop.permute.xlu2 %1486 }
0x15c0   :  { %1489 = vst.msk [vmem:[%s2307_s19] sm:$0x3] %vm1475_vm1, %v1487_v8 }
0x15d7   :  { %v1483_v25 = vpop.permute.xlu1 %1482 }
0x15d8   :  { %1485 = vst.msk [vmem:[%s2306_s18] sm:$0x3] %vm1475_vm1, %v1483_v25  ;;  %v1479_v31 = vpop.permute.xlu0 %1478 }
0x15d9   :  { %1481 = vst.msk [vmem:[%s2305_s17] sm:$0x3] %vm1475_vm1, %v1479_v31 }
0x15da   :  { %1506 = vsyncpa [#allocation3], 1 }
0x15db   :  { %1507 = vsyncpa [#allocation5], 1 }
0x15dc   :  { %1508 = vsyncpa [#allocation8], 1 }
0x15dd   :  { %1509 = vsyncpa [#allocation11], 1 }

</bundles_post_ra>
